<compile_context>
chip_gen: v6e
topology: v6e:2x2x1
jax: 0.10.0
libtpu: 0.0.40
codegen_flags: <defaults>
</compile_context>

<pallas_src>
import jax
import jax.numpy as jnp
from jax import lax
from jax.experimental import pallas as pl
from jax.experimental.pallas import tpu as pltpu

KSIZE = 7
PAD = KSIZE // 2


def _round_up(x, m):
    return (x + m - 1) // m * m


def spatial_attention(x, conv_weight):
    """x: (B, C, H, W); conv_weight: (1, 2, K, K) OIHW float, no bias."""
    B, C, H, W = x.shape

    w_out = _round_up(W, 128)          # lane-dense output width
    hp = H + 2 * PAD
    hp_pad = _round_up(hp, 8)          # sublane-aligned padded-plane height
    w_pool = w_out + 128               # >= kw + w_out for kw<=6, multiple of 128

    # Channel tile: stream the C-reduction through the last grid axis.
    c_tile = next(t for t in (32, 16, 8, 4, 2, 1) if C % t == 0)
    num_cb = C // c_tile

    w_flat = conv_weight.astype(jnp.float32).reshape(-1)   # (2*K*K,)

    def kernel(w_ref, x_ref, o_ref, acc_ref, pool_ref, shift_ref):
        # w_ref:     SMEM (2*K*K,) f32          conv weights, flattened [in_c, kh, kw]
        # x_ref:     VMEM (1, c_tile, H, W)     unpadded input channel chunk
        # o_ref:     VMEM (1, 1, H, w_out)      attention map (lane-dense)
        # acc_ref:   VMEM (2, H, W) f32         running channel sum / max
        # pool_ref:  VMEM (2, hp_pad, w_pool)   zero-padded pooled maps
        # shift_ref: VMEM (hp_pad, w_out)       one lane-shifted plane (reused)
        cb = pl.program_id(1)

        # ---- streamed channel reduction over this chunk (VPU adds/maxes) ----
        xb = x_ref[0]                                        # (c_tile, H, W)
        chunk_sum = jnp.sum(xb, axis=0, dtype=jnp.float32)   # (H, W)
        chunk_max = jnp.max(xb, axis=0).astype(jnp.float32)  # (H, W)

        @pl.when(cb == 0)
        def _init():
            acc_ref[0] = jnp.zeros((H, W), jnp.float32)
            acc_ref[1] = jnp.full((H, W), -jnp.inf, jnp.float32)

        acc_ref[0] = acc_ref[0] + chunk_sum
        acc_ref[1] = jnp.maximum(acc_ref[1], chunk_max)

        # ---- last channel chunk: pad pooled maps, 7x7 conv, sigmoid, store ----
        @pl.when(cb == num_cb - 1)
        def _finalize():
            # Zero-padded pooled maps placed at offset (PAD, PAD); zero padding
            # of the pooled maps matches PyTorch's conv padding of zeros.
            pool_ref[...] = jnp.zeros_like(pool_ref)
            pool_ref[0, PAD:PAD + H, PAD:PAD + W] = acc_ref[0] * (1.0 / C)  # mean
            pool_ref[1, PAD:PAD + H, PAD:PAD + W] = acc_ref[1]              # max

            # Hoist all scalar weight reads out of the MAC loop.
            wl = [w_ref[i] for i in range(2 * KSIZE * KSIZE)]

            acc = jnp.zeros((H, w_out), jnp.float32)
            for c in range(2):
                for kw in range(KSIZE):
                    # One lane-shifted copy per (map, kw): 14 relayouts total.
                    shift_ref[...] = pool_ref[c, :, kw:kw + w_out]
                    for kh in range(KSIZE):
                        w = wl[(c * KSIZE + kh) * KSIZE + kw]
                        # Aligned sublane-offset load + scalar*vector FMA (VPU).
                        acc = acc + w * shift_ref[kh:kh + H, :]

            o_ref[0, 0] = jax.nn.sigmoid(acc).astype(o_ref.dtype)

    out = pl.pallas_call(
        kernel,
        out_shape=jax.ShapeDtypeStruct((B, 1, H, w_out), x.dtype),
        grid_spec=pltpu.PrefetchScalarGridSpec(
            num_scalar_prefetch=0,
            grid=(B, num_cb),                                   # reduction axis last
            in_specs=[
                pl.BlockSpec(memory_space=pltpu.MemorySpace.SMEM),           # weights
                pl.BlockSpec((1, c_tile, H, W), lambda b, cb: (b, cb, 0, 0)),  # x (unpadded)
            ],
            out_specs=pl.BlockSpec((1, 1, H, w_out), lambda b, cb: (b, 0, 0, 0)),
            scratch_shapes=[
                pltpu.VMEM((2, H, W), jnp.float32),             # running sum / max
                pltpu.VMEM((2, hp_pad, w_pool), jnp.float32),   # padded pooled maps
                pltpu.VMEM((hp_pad, w_out), jnp.float32),       # lane-shifted plane
            ],
        ),
        compiler_params=pltpu.CompilerParams(
            dimension_semantics=("parallel", "arbitrary"),
            vmem_limit_bytes=32 * 1024 * 1024,
        ),
    )(w_flat, x)

    return out[..., :W]


def spatial_attention_ref(x, conv_weight):
    """Plain-JAX reference matching the PyTorch forward."""
    avg_out = jnp.mean(x, axis=1, keepdims=True)
    max_out = jnp.max(x, axis=1, keepdims=True)
    feat = jnp.concatenate([avg_out, max_out], axis=1)
    out = lax.conv_general_dilated(
        feat, conv_weight, window_strides=(1, 1),
        padding=((PAD, PAD), (PAD, PAD)),
        dimension_numbers=("NCHW", "OIHW", "NCHW"))
    return jax.nn.sigmoid(out)


if __name__ == "__main__":
    key = jax.random.PRNGKey(0)
    kx, kw = jax.random.split(key)

    B, C, H, W = 2, 4, 16, 16
    x = jax.random.normal(kx, (B, C, H, W), dtype=jnp.float32)

    # Deterministic conv weight init (uniform, like PyTorch's default bound):
    fan_in = 2 * KSIZE * KSIZE
    bound = 1.0 / (fan_in ** 0.5)
    conv_weight = jax.random.uniform(kw, (1, 2, KSIZE, KSIZE), jnp.float32,
                                     minval=-bound, maxval=bound)

    out = spatial_attention(x, conv_weight)
    out = jax.block_until_ready(out)

    ref = spatial_attention_ref(x, conv_weight)
    assert out.shape == (B, 1, H, W)
    assert jnp.allclose(out, ref, atol=1e-5, rtol=1e-5)

    print("KERNEL_OK")
</pallas_src>

<mosaic_0001>
module attributes {stable_mosaic.version = 11 : i64} {
  func.func @kernel(%arg0: i32, %arg1: i32, %arg2: memref<98xf32, #tpu.memory_space<smem>>, %arg3: memref<1x4x16x16xf32, #tpu.memory_space<vmem>>, %arg4: memref<1x1x16x128xf32, #tpu.memory_space<vmem>>, %arg5: memref<2x16x16xf32, #tpu.memory_space<vmem>>, %arg6: memref<2x24x256xf32, #tpu.memory_space<vmem>>, %arg7: memref<24x128xf32, #tpu.memory_space<vmem>>) attributes {dimension_semantics = [#tpu.dimension_semantics<parallel>, #tpu.dimension_semantics<arbitrary>], iteration_bounds = array<i64: 2, 1>, scalar_prefetch = 0 : i64, scratch_operands = 3 : i64, tpu.core_type = #tpu.core_type<tc>, window_params = [{transform_indices = @transform_0, window_bounds = array<i64: 98>}, {transform_indices = @transform_1, window_bounds = array<i64: 1, 4, 16, 16>}, {transform_indices = @transform_2, window_bounds = array<i64: 1, 1, 16, 128>}]} {
    %c0 = arith.constant 0 : index
    %c0_0 = arith.constant 0 : index
    %c0_1 = arith.constant 0 : index
    %c0_2 = arith.constant 0 : index
    %0 = vector.load %arg3[%c0, %c0_0, %c0_1, %c0_2] : memref<1x4x16x16xf32, #tpu.memory_space<vmem>>, vector<1x4x16x16xf32>
    %1 = vector.shape_cast %0 : vector<1x4x16x16xf32> to vector<4x16x16xf32>
    %cst = arith.constant dense<0.000000e+00> : vector<16x16xf32>
    %2 = vector.multi_reduction <add>, %1, %cst [0] : vector<4x16x16xf32> to vector<16x16xf32>
    %cst_3 = arith.constant dense<0xFF800000> : vector<16x16xf32>
    %3 = vector.multi_reduction <maximumf>, %1, %cst_3 [0] : vector<4x16x16xf32> to vector<16x16xf32>
    %c0_i32 = arith.constant 0 : i32
    %4 = arith.cmpi eq, %arg1, %c0_i32 : i32
    %5 = arith.extui %4 : i1 to i32
    %c0_i32_4 = arith.constant 0 : i32
    %6 = arith.cmpi ne, %5, %c0_i32_4 : i32
    scf.if %6 {
      %cst_18 = arith.constant 0.000000e+00 : f32
      %22 = vector.broadcast %cst_18 : f32 to vector<16x16xf32>
      %c0_19 = arith.constant 0 : index
      %c0_20 = arith.constant 0 : index
      %c0_21 = arith.constant 0 : index
      %23 = vector.load %arg5[%c0_19, %c0_20, %c0_21] : memref<2x16x16xf32, #tpu.memory_space<vmem>>, vector<1x16x16xf32>
      %24 = vector.shape_cast %23 : vector<1x16x16xf32> to vector<16x16xf32>
      %25 = vector.shape_cast %22 : vector<16x16xf32> to vector<1x16x16xf32>
      tpu.vector_store %arg5[%c0_19, %c0_20, %c0_21], %25 {strides = array<i32>} : memref<2x16x16xf32, #tpu.memory_space<vmem>>, vector<1x16x16xf32>,
      %cst_22 = arith.constant 0xFF800000 : f32
      %26 = vector.broadcast %cst_22 : f32 to vector<16x16xf32>
      %c1_23 = arith.constant 1 : index
      %c0_24 = arith.constant 0 : index
      %c0_25 = arith.constant 0 : index
      %27 = vector.load %arg5[%c1_23, %c0_24, %c0_25] : memref<2x16x16xf32, #tpu.memory_space<vmem>>, vector<1x16x16xf32>
      %28 = vector.shape_cast %27 : vector<1x16x16xf32> to vector<16x16xf32>
      %29 = vector.shape_cast %26 : vector<16x16xf32> to vector<1x16x16xf32>
      tpu.vector_store %arg5[%c1_23, %c0_24, %c0_25], %29 {strides = array<i32>} : memref<2x16x16xf32, #tpu.memory_space<vmem>>, vector<1x16x16xf32>,
    } else {
    }
    %c0_5 = arith.constant 0 : index
    %c0_6 = arith.constant 0 : index
    %c0_7 = arith.constant 0 : index
    %7 = vector.load %arg5[%c0_5, %c0_6, %c0_7] : memref<2x16x16xf32, #tpu.memory_space<vmem>>, vector<1x16x16xf32>
    %8 = vector.shape_cast %7 : vector<1x16x16xf32> to vector<16x16xf32>
    %9 = arith.addf %8, %2 : vector<16x16xf32>
    %c0_8 = arith.constant 0 : index
    %c0_9 = arith.constant 0 : index
    %c0_10 = arith.constant 0 : index
    %10 = vector.load %arg5[%c0_8, %c0_9, %c0_10] : memref<2x16x16xf32, #tpu.memory_space<vmem>>, vector<1x16x16xf32>
    %11 = vector.shape_cast %10 : vector<1x16x16xf32> to vector<16x16xf32>
    %12 = vector.shape_cast %9 : vector<16x16xf32> to vector<1x16x16xf32>
    tpu.vector_store %arg5[%c0_8, %c0_9, %c0_10], %12 {strides = array<i32>} : memref<2x16x16xf32, #tpu.memory_space<vmem>>, vector<1x16x16xf32>,
    %c1 = arith.constant 1 : index
    %c0_11 = arith.constant 0 : index
    %c0_12 = arith.constant 0 : index
    %13 = vector.load %arg5[%c1, %c0_11, %c0_12] : memref<2x16x16xf32, #tpu.memory_space<vmem>>, vector<1x16x16xf32>
    %14 = vector.shape_cast %13 : vector<1x16x16xf32> to vector<16x16xf32>
    %15 = arith.maximumf %14, %3 : vector<16x16xf32>
    %c1_13 = arith.constant 1 : index
    %c0_14 = arith.constant 0 : index
    %c0_15 = arith.constant 0 : index
    %16 = vector.load %arg5[%c1_13, %c0_14, %c0_15] : memref<2x16x16xf32, #tpu.memory_space<vmem>>, vector<1x16x16xf32>
    %17 = vector.shape_cast %16 : vector<1x16x16xf32> to vector<16x16xf32>
    %18 = vector.shape_cast %15 : vector<16x16xf32> to vector<1x16x16xf32>
    tpu.vector_store %arg5[%c1_13, %c0_14, %c0_15], %18 {strides = array<i32>} : memref<2x16x16xf32, #tpu.memory_space<vmem>>, vector<1x16x16xf32>,
    %c0_i32_16 = arith.constant 0 : i32
    %19 = arith.cmpi eq, %arg1, %c0_i32_16 : i32
    %20 = arith.extui %19 : i1 to i32
    %c0_i32_17 = arith.constant 0 : i32
    %21 = arith.cmpi ne, %20, %c0_i32_17 : i32
    scf.if %21 {
      %cst_18 = arith.constant 0.000000e+00 : f32
      %22 = vector.broadcast %cst_18 : f32 to vector<2x24x256xf32>
      %c0_19 = arith.constant 0 : index
      %c0_20 = arith.constant 0 : index
      %c0_21 = arith.constant 0 : index
      %23 = vector.load %arg6[%c0_19, %c0_20, %c0_21] : memref<2x24x256xf32, #tpu.memory_space<vmem>>, vector<2x24x256xf32>
      tpu.vector_store %arg6[%c0_19, %c0_20, %c0_21], %22 {strides = array<i32>} : memref<2x24x256xf32, #tpu.memory_space<vmem>>, vector<2x24x256xf32>,
      %c0_22 = arith.constant 0 : index
      %c0_23 = arith.constant 0 : index
      %c0_24 = arith.constant 0 : index
      %24 = vector.load %arg5[%c0_22, %c0_23, %c0_24] : memref<2x16x16xf32, #tpu.memory_space<vmem>>, vector<1x16x16xf32>
      %25 = vector.shape_cast %24 : vector<1x16x16xf32> to vector<16x16xf32>
      %cst_25 = arith.constant 2.500000e-01 : f32
      %26 = vector.broadcast %cst_25 : f32 to vector<16x16xf32>
      %27 = arith.mulf %25, %26 : vector<16x16xf32>
      %c0_26 = arith.constant 0 : index
      %c3 = arith.constant 3 : index
      %c3_27 = arith.constant 3 : index
      %28 = vector.load %arg6[%c0_26, %c3, %c3_27] : memref<2x24x256xf32, #tpu.memory_space<vmem>>, vector<1x16x16xf32>
      %29 = vector.shape_cast %28 : vector<1x16x16xf32> to vector<16x16xf32>
      %30 = vector.shape_cast %27 : vector<16x16xf32> to vector<1x16x16xf32>
      tpu.vector_store %arg6[%c0_26, %c3, %c3_27], %30 {strides = array<i32>} : memref<2x24x256xf32, #tpu.memory_space<vmem>>, vector<1x16x16xf32>,
      %c1_28 = arith.constant 1 : index
      %c0_29 = arith.constant 0 : index
      %c0_30 = arith.constant 0 : index
      %31 = vector.load %arg5[%c1_28, %c0_29, %c0_30] : memref<2x16x16xf32, #tpu.memory_space<vmem>>, vector<1x16x16xf32>
      %32 = vector.shape_cast %31 : vector<1x16x16xf32> to vector<16x16xf32>
      %c1_31 = arith.constant 1 : index
      %c3_32 = arith.constant 3 : index
      %c3_33 = arith.constant 3 : index
      %33 = vector.load %arg6[%c1_31, %c3_32, %c3_33] : memref<2x24x256xf32, #tpu.memory_space<vmem>>, vector<1x16x16xf32>
      %34 = vector.shape_cast %33 : vector<1x16x16xf32> to vector<16x16xf32>
      %35 = vector.shape_cast %32 : vector<16x16xf32> to vector<1x16x16xf32>
      tpu.vector_store %arg6[%c1_31, %c3_32, %c3_33], %35 {strides = array<i32>} : memref<2x24x256xf32, #tpu.memory_space<vmem>>, vector<1x16x16xf32>,
      %c0_34 = arith.constant 0 : index
      %36 = memref.load %arg2[%c0_34] : memref<98xf32, #tpu.memory_space<smem>>
      %c1_35 = arith.constant 1 : index
      %37 = memref.load %arg2[%c1_35] : memref<98xf32, #tpu.memory_space<smem>>
      %c2 = arith.constant 2 : index
      %38 = memref.load %arg2[%c2] : memref<98xf32, #tpu.memory_space<smem>>
      %c3_36 = arith.constant 3 : index
      %39 = memref.load %arg2[%c3_36] : memref<98xf32, #tpu.memory_space<smem>>
      %c4 = arith.constant 4 : index
      %40 = memref.load %arg2[%c4] : memref<98xf32, #tpu.memory_space<smem>>
      %c5 = arith.constant 5 : index
      %41 = memref.load %arg2[%c5] : memref<98xf32, #tpu.memory_space<smem>>
      %c6 = arith.constant 6 : index
      %42 = memref.load %arg2[%c6] : memref<98xf32, #tpu.memory_space<smem>>
      %c7 = arith.constant 7 : index
      %43 = memref.load %arg2[%c7] : memref<98xf32, #tpu.memory_space<smem>>
      %c8 = arith.constant 8 : index
      %44 = memref.load %arg2[%c8] : memref<98xf32, #tpu.memory_space<smem>>
      %c9 = arith.constant 9 : index
      %45 = memref.load %arg2[%c9] : memref<98xf32, #tpu.memory_space<smem>>
      %c10 = arith.constant 10 : index
      %46 = memref.load %arg2[%c10] : memref<98xf32, #tpu.memory_space<smem>>
      %c11 = arith.constant 11 : index
      %47 = memref.load %arg2[%c11] : memref<98xf32, #tpu.memory_space<smem>>
      %c12 = arith.constant 12 : index
      %48 = memref.load %arg2[%c12] : memref<98xf32, #tpu.memory_space<smem>>
      %c13 = arith.constant 13 : index
      %49 = memref.load %arg2[%c13] : memref<98xf32, #tpu.memory_space<smem>>
      %c14 = arith.constant 14 : index
      %50 = memref.load %arg2[%c14] : memref<98xf32, #tpu.memory_space<smem>>
      %c15 = arith.constant 15 : index
      %51 = memref.load %arg2[%c15] : memref<98xf32, #tpu.memory_space<smem>>
      %c16 = arith.constant 16 : index
      %52 = memref.load %arg2[%c16] : memref<98xf32, #tpu.memory_space<smem>>
      %c17 = arith.constant 17 : index
      %53 = memref.load %arg2[%c17] : memref<98xf32, #tpu.memory_space<smem>>
      %c18 = arith.constant 18 : index
      %54 = memref.load %arg2[%c18] : memref<98xf32, #tpu.memory_space<smem>>
      %c19 = arith.constant 19 : index
      %55 = memref.load %arg2[%c19] : memref<98xf32, #tpu.memory_space<smem>>
      %c20 = arith.constant 20 : index
      %56 = memref.load %arg2[%c20] : memref<98xf32, #tpu.memory_space<smem>>
      %c21 = arith.constant 21 : index
      %57 = memref.load %arg2[%c21] : memref<98xf32, #tpu.memory_space<smem>>
      %c22 = arith.constant 22 : index
      %58 = memref.load %arg2[%c22] : memref<98xf32, #tpu.memory_space<smem>>
      %c23 = arith.constant 23 : index
      %59 = memref.load %arg2[%c23] : memref<98xf32, #tpu.memory_space<smem>>
      %c24 = arith.constant 24 : index
      %60 = memref.load %arg2[%c24] : memref<98xf32, #tpu.memory_space<smem>>
      %c25 = arith.constant 25 : index
      %61 = memref.load %arg2[%c25] : memref<98xf32, #tpu.memory_space<smem>>
      %c26 = arith.constant 26 : index
      %62 = memref.load %arg2[%c26] : memref<98xf32, #tpu.memory_space<smem>>
      %c27 = arith.constant 27 : index
      %63 = memref.load %arg2[%c27] : memref<98xf32, #tpu.memory_space<smem>>
      %c28 = arith.constant 28 : index
      %64 = memref.load %arg2[%c28] : memref<98xf32, #tpu.memory_space<smem>>
      %c29 = arith.constant 29 : index
      %65 = memref.load %arg2[%c29] : memref<98xf32, #tpu.memory_space<smem>>
      %c30 = arith.constant 30 : index
      %66 = memref.load %arg2[%c30] : memref<98xf32, #tpu.memory_space<smem>>
      %c31 = arith.constant 31 : index
      %67 = memref.load %arg2[%c31] : memref<98xf32, #tpu.memory_space<smem>>
      %c32 = arith.constant 32 : index
      %68 = memref.load %arg2[%c32] : memref<98xf32, #tpu.memory_space<smem>>
      %c33 = arith.constant 33 : index
      %69 = memref.load %arg2[%c33] : memref<98xf32, #tpu.memory_space<smem>>
      %c34 = arith.constant 34 : index
      %70 = memref.load %arg2[%c34] : memref<98xf32, #tpu.memory_space<smem>>
      %c35 = arith.constant 35 : index
      %71 = memref.load %arg2[%c35] : memref<98xf32, #tpu.memory_space<smem>>
      %c36 = arith.constant 36 : index
      %72 = memref.load %arg2[%c36] : memref<98xf32, #tpu.memory_space<smem>>
      %c37 = arith.constant 37 : index
      %73 = memref.load %arg2[%c37] : memref<98xf32, #tpu.memory_space<smem>>
      %c38 = arith.constant 38 : index
      %74 = memref.load %arg2[%c38] : memref<98xf32, #tpu.memory_space<smem>>
      %c39 = arith.constant 39 : index
      %75 = memref.load %arg2[%c39] : memref<98xf32, #tpu.memory_space<smem>>
      %c40 = arith.constant 40 : index
      %76 = memref.load %arg2[%c40] : memref<98xf32, #tpu.memory_space<smem>>
      %c41 = arith.constant 41 : index
      %77 = memref.load %arg2[%c41] : memref<98xf32, #tpu.memory_space<smem>>
      %c42 = arith.constant 42 : index
      %78 = memref.load %arg2[%c42] : memref<98xf32, #tpu.memory_space<smem>>
      %c43 = arith.constant 43 : index
      %79 = memref.load %arg2[%c43] : memref<98xf32, #tpu.memory_space<smem>>
      %c44 = arith.constant 44 : index
      %80 = memref.load %arg2[%c44] : memref<98xf32, #tpu.memory_space<smem>>
      %c45 = arith.constant 45 : index
      %81 = memref.load %arg2[%c45] : memref<98xf32, #tpu.memory_space<smem>>
      %c46 = arith.constant 46 : index
      %82 = memref.load %arg2[%c46] : memref<98xf32, #tpu.memory_space<smem>>
      %c47 = arith.constant 47 : index
      %83 = memref.load %arg2[%c47] : memref<98xf32, #tpu.memory_space<smem>>
      %c48 = arith.constant 48 : index
      %84 = memref.load %arg2[%c48] : memref<98xf32, #tpu.memory_space<smem>>
      %c49 = arith.constant 49 : index
      %85 = memref.load %arg2[%c49] : memref<98xf32, #tpu.memory_space<smem>>
      %c50 = arith.constant 50 : index
      %86 = memref.load %arg2[%c50] : memref<98xf32, #tpu.memory_space<smem>>
      %c51 = arith.constant 51 : index
      %87 = memref.load %arg2[%c51] : memref<98xf32, #tpu.memory_space<smem>>
      %c52 = arith.constant 52 : index
      %88 = memref.load %arg2[%c52] : memref<98xf32, #tpu.memory_space<smem>>
      %c53 = arith.constant 53 : index
      %89 = memref.load %arg2[%c53] : memref<98xf32, #tpu.memory_space<smem>>
      %c54 = arith.constant 54 : index
      %90 = memref.load %arg2[%c54] : memref<98xf32, #tpu.memory_space<smem>>
      %c55 = arith.constant 55 : index
      %91 = memref.load %arg2[%c55] : memref<98xf32, #tpu.memory_space<smem>>
      %c56 = arith.constant 56 : index
      %92 = memref.load %arg2[%c56] : memref<98xf32, #tpu.memory_space<smem>>
      %c57 = arith.constant 57 : index
      %93 = memref.load %arg2[%c57] : memref<98xf32, #tpu.memory_space<smem>>
      %c58 = arith.constant 58 : index
      %94 = memref.load %arg2[%c58] : memref<98xf32, #tpu.memory_space<smem>>
      %c59 = arith.constant 59 : index
      %95 = memref.load %arg2[%c59] : memref<98xf32, #tpu.memory_space<smem>>
      %c60 = arith.constant 60 : index
      %96 = memref.load %arg2[%c60] : memref<98xf32, #tpu.memory_space<smem>>
      %c61 = arith.constant 61 : index
      %97 = memref.load %arg2[%c61] : memref<98xf32, #tpu.memory_space<smem>>
      %c62 = arith.constant 62 : index
      %98 = memref.load %arg2[%c62] : memref<98xf32, #tpu.memory_space<smem>>
      %c63 = arith.constant 63 : index
      %99 = memref.load %arg2[%c63] : memref<98xf32, #tpu.memory_space<smem>>
      %c64 = arith.constant 64 : index
      %100 = memref.load %arg2[%c64] : memref<98xf32, #tpu.memory_space<smem>>
      %c65 = arith.constant 65 : index
      %101 = memref.load %arg2[%c65] : memref<98xf32, #tpu.memory_space<smem>>
      %c66 = arith.constant 66 : index
      %102 = memref.load %arg2[%c66] : memref<98xf32, #tpu.memory_space<smem>>
      %c67 = arith.constant 67 : index
      %103 = memref.load %arg2[%c67] : memref<98xf32, #tpu.memory_space<smem>>
      %c68 = arith.constant 68 : index
      %104 = memref.load %arg2[%c68] : memref<98xf32, #tpu.memory_space<smem>>
      %c69 = arith.constant 69 : index
      %105 = memref.load %arg2[%c69] : memref<98xf32, #tpu.memory_space<smem>>
      %c70 = arith.constant 70 : index
      %106 = memref.load %arg2[%c70] : memref<98xf32, #tpu.memory_space<smem>>
      %c71 = arith.constant 71 : index
      %107 = memref.load %arg2[%c71] : memref<98xf32, #tpu.memory_space<smem>>
      %c72 = arith.constant 72 : index
      %108 = memref.load %arg2[%c72] : memref<98xf32, #tpu.memory_space<smem>>
      %c73 = arith.constant 73 : index
      %109 = memref.load %arg2[%c73] : memref<98xf32, #tpu.memory_space<smem>>
      %c74 = arith.constant 74 : index
      %110 = memref.load %arg2[%c74] : memref<98xf32, #tpu.memory_space<smem>>
      %c75 = arith.constant 75 : index
      %111 = memref.load %arg2[%c75] : memref<98xf32, #tpu.memory_space<smem>>
      %c76 = arith.constant 76 : index
      %112 = memref.load %arg2[%c76] : memref<98xf32, #tpu.memory_space<smem>>
      %c77 = arith.constant 77 : index
      %113 = memref.load %arg2[%c77] : memref<98xf32, #tpu.memory_space<smem>>
      %c78 = arith.constant 78 : index
      %114 = memref.load %arg2[%c78] : memref<98xf32, #tpu.memory_space<smem>>
      %c79 = arith.constant 79 : index
      %115 = memref.load %arg2[%c79] : memref<98xf32, #tpu.memory_space<smem>>
      %c80 = arith.constant 80 : index
      %116 = memref.load %arg2[%c80] : memref<98xf32, #tpu.memory_space<smem>>
      %c81 = arith.constant 81 : index
      %117 = memref.load %arg2[%c81] : memref<98xf32, #tpu.memory_space<smem>>
      %c82 = arith.constant 82 : index
      %118 = memref.load %arg2[%c82] : memref<98xf32, #tpu.memory_space<smem>>
      %c83 = arith.constant 83 : index
      %119 = memref.load %arg2[%c83] : memref<98xf32, #tpu.memory_space<smem>>
      %c84 = arith.constant 84 : index
      %120 = memref.load %arg2[%c84] : memref<98xf32, #tpu.memory_space<smem>>
      %c85 = arith.constant 85 : index
      %121 = memref.load %arg2[%c85] : memref<98xf32, #tpu.memory_space<smem>>
      %c86 = arith.constant 86 : index
      %122 = memref.load %arg2[%c86] : memref<98xf32, #tpu.memory_space<smem>>
      %c87 = arith.constant 87 : index
      %123 = memref.load %arg2[%c87] : memref<98xf32, #tpu.memory_space<smem>>
      %c88 = arith.constant 88 : index
      %124 = memref.load %arg2[%c88] : memref<98xf32, #tpu.memory_space<smem>>
      %c89 = arith.constant 89 : index
      %125 = memref.load %arg2[%c89] : memref<98xf32, #tpu.memory_space<smem>>
      %c90 = arith.constant 90 : index
      %126 = memref.load %arg2[%c90] : memref<98xf32, #tpu.memory_space<smem>>
      %c91 = arith.constant 91 : index
      %127 = memref.load %arg2[%c91] : memref<98xf32, #tpu.memory_space<smem>>
      %c92 = arith.constant 92 : index
      %128 = memref.load %arg2[%c92] : memref<98xf32, #tpu.memory_space<smem>>
      %c93 = arith.constant 93 : index
      %129 = memref.load %arg2[%c93] : memref<98xf32, #tpu.memory_space<smem>>
      %c94 = arith.constant 94 : index
      %130 = memref.load %arg2[%c94] : memref<98xf32, #tpu.memory_space<smem>>
      %c95 = arith.constant 95 : index
      %131 = memref.load %arg2[%c95] : memref<98xf32, #tpu.memory_space<smem>>
      %c96 = arith.constant 96 : index
      %132 = memref.load %arg2[%c96] : memref<98xf32, #tpu.memory_space<smem>>
      %c97 = arith.constant 97 : index
      %133 = memref.load %arg2[%c97] : memref<98xf32, #tpu.memory_space<smem>>
      %cst_37 = arith.constant 0.000000e+00 : f32
      %134 = vector.broadcast %cst_37 : f32 to vector<16x128xf32>
      %c0_38 = arith.constant 0 : index
      %c0_39 = arith.constant 0 : index
      %c0_40 = arith.constant 0 : index
      %135 = vector.load %arg6[%c0_38, %c0_39, %c0_40] : memref<2x24x256xf32, #tpu.memory_space<vmem>>, vector<1x24x128xf32>
      %136 = vector.shape_cast %135 : vector<1x24x128xf32> to vector<24x128xf32>
      %c0_41 = arith.constant 0 : index
      %c0_42 = arith.constant 0 : index
      %137 = vector.load %arg7[%c0_41, %c0_42] : memref<24x128xf32, #tpu.memory_space<vmem>>, vector<24x128xf32>
      tpu.vector_store %arg7[%c0_41, %c0_42], %136 {strides = array<i32>} : memref<24x128xf32, #tpu.memory_space<vmem>>, vector<24x128xf32>,
      %c0_43 = arith.constant 0 : index
      %c0_44 = arith.constant 0 : index
      %138 = vector.load %arg7[%c0_43, %c0_44] : memref<24x128xf32, #tpu.memory_space<vmem>>, vector<16x128xf32>
      %139 = vector.broadcast %36 : f32 to vector<16x128xf32>
      %140 = arith.mulf %139, %138 : vector<16x128xf32>
      %141 = arith.addf %134, %140 : vector<16x128xf32>
      %c1_45 = arith.constant 1 : index
      %c0_46 = arith.constant 0 : index
      %142 = vector.load %arg7[%c1_45, %c0_46] : memref<24x128xf32, #tpu.memory_space<vmem>>, vector<16x128xf32>
      %143 = vector.broadcast %43 : f32 to vector<16x128xf32>
      %144 = arith.mulf %143, %142 : vector<16x128xf32>
      %145 = arith.addf %141, %144 : vector<16x128xf32>
      %c2_47 = arith.constant 2 : index
      %c0_48 = arith.constant 0 : index
      %146 = vector.load %arg7[%c2_47, %c0_48] : memref<24x128xf32, #tpu.memory_space<vmem>>, vector<16x128xf32>
      %147 = vector.broadcast %50 : f32 to vector<16x128xf32>
      %148 = arith.mulf %147, %146 : vector<16x128xf32>
      %149 = arith.addf %145, %148 : vector<16x128xf32>
      %c3_49 = arith.constant 3 : index
      %c0_50 = arith.constant 0 : index
      %150 = vector.load %arg7[%c3_49, %c0_50] : memref<24x128xf32, #tpu.memory_space<vmem>>, vector<16x128xf32>
      %151 = vector.broadcast %57 : f32 to vector<16x128xf32>
      %152 = arith.mulf %151, %150 : vector<16x128xf32>
      %153 = arith.addf %149, %152 : vector<16x128xf32>
      %c4_51 = arith.constant 4 : index
      %c0_52 = arith.constant 0 : index
      %154 = vector.load %arg7[%c4_51, %c0_52] : memref<24x128xf32, #tpu.memory_space<vmem>>, vector<16x128xf32>
      %155 = vector.broadcast %64 : f32 to vector<16x128xf32>
      %156 = arith.mulf %155, %154 : vector<16x128xf32>
      %157 = arith.addf %153, %156 : vector<16x128xf32>
      %c5_53 = arith.constant 5 : index
      %c0_54 = arith.constant 0 : index
      %158 = vector.load %arg7[%c5_53, %c0_54] : memref<24x128xf32, #tpu.memory_space<vmem>>, vector<16x128xf32>
      %159 = vector.broadcast %71 : f32 to vector<16x128xf32>
      %160 = arith.mulf %159, %158 : vector<16x128xf32>
      %161 = arith.addf %157, %160 : vector<16x128xf32>
      %c6_55 = arith.constant 6 : index
      %c0_56 = arith.constant 0 : index
      %162 = vector.load %arg7[%c6_55, %c0_56] : memref<24x128xf32, #tpu.memory_space<vmem>>, vector<16x128xf32>
      %163 = vector.broadcast %78 : f32 to vector<16x128xf32>
      %164 = arith.mulf %163, %162 : vector<16x128xf32>
      %165 = arith.addf %161, %164 : vector<16x128xf32>
      %c0_57 = arith.constant 0 : index
      %c0_58 = arith.constant 0 : index
      %c1_59 = arith.constant 1 : index
      %166 = vector.load %arg6[%c0_57, %c0_58, %c1_59] : memref<2x24x256xf32, #tpu.memory_space<vmem>>, vector<1x24x128xf32>
      %167 = vector.shape_cast %166 : vector<1x24x128xf32> to vector<24x128xf32>
      %c0_60 = arith.constant 0 : index
      %c0_61 = arith.constant 0 : index
      %168 = vector.load %arg7[%c0_60, %c0_61] : memref<24x128xf32, #tpu.memory_space<vmem>>, vector<24x128xf32>
      tpu.vector_store %arg7[%c0_60, %c0_61], %167 {strides = array<i32>} : memref<24x128xf32, #tpu.memory_space<vmem>>, vector<24x128xf32>,
      %c0_62 = arith.constant 0 : index
      %c0_63 = arith.constant 0 : index
      %169 = vector.load %arg7[%c0_62, %c0_63] : memref<24x128xf32, #tpu.memory_space<vmem>>, vector<16x128xf32>
      %170 = vector.broadcast %37 : f32 to vector<16x128xf32>
      %171 = arith.mulf %170, %169 : vector<16x128xf32>
      %172 = arith.addf %165, %171 : vector<16x128xf32>
      %c1_64 = arith.constant 1 : index
      %c0_65 = arith.constant 0 : index
      %173 = vector.load %arg7[%c1_64, %c0_65] : memref<24x128xf32, #tpu.memory_space<vmem>>, vector<16x128xf32>
      %174 = vector.broadcast %44 : f32 to vector<16x128xf32>
      %175 = arith.mulf %174, %173 : vector<16x128xf32>
      %176 = arith.addf %172, %175 : vector<16x128xf32>
      %c2_66 = arith.constant 2 : index
      %c0_67 = arith.constant 0 : index
      %177 = vector.load %arg7[%c2_66, %c0_67] : memref<24x128xf32, #tpu.memory_space<vmem>>, vector<16x128xf32>
      %178 = vector.broadcast %51 : f32 to vector<16x128xf32>
      %179 = arith.mulf %178, %177 : vector<16x128xf32>
      %180 = arith.addf %176, %179 : vector<16x128xf32>
      %c3_68 = arith.constant 3 : index
      %c0_69 = arith.constant 0 : index
      %181 = vector.load %arg7[%c3_68, %c0_69] : memref<24x128xf32, #tpu.memory_space<vmem>>, vector<16x128xf32>
      %182 = vector.broadcast %58 : f32 to vector<16x128xf32>
      %183 = arith.mulf %182, %181 : vector<16x128xf32>
      %184 = arith.addf %180, %183 : vector<16x128xf32>
      %c4_70 = arith.constant 4 : index
      %c0_71 = arith.constant 0 : index
      %185 = vector.load %arg7[%c4_70, %c0_71] : memref<24x128xf32, #tpu.memory_space<vmem>>, vector<16x128xf32>
      %186 = vector.broadcast %65 : f32 to vector<16x128xf32>
      %187 = arith.mulf %186, %185 : vector<16x128xf32>
      %188 = arith.addf %184, %187 : vector<16x128xf32>
      %c5_72 = arith.constant 5 : index
      %c0_73 = arith.constant 0 : index
      %189 = vector.load %arg7[%c5_72, %c0_73] : memref<24x128xf32, #tpu.memory_space<vmem>>, vector<16x128xf32>
      %190 = vector.broadcast %72 : f32 to vector<16x128xf32>
      %191 = arith.mulf %190, %189 : vector<16x128xf32>
      %192 = arith.addf %188, %191 : vector<16x128xf32>
      %c6_74 = arith.constant 6 : index
      %c0_75 = arith.constant 0 : index
      %193 = vector.load %arg7[%c6_74, %c0_75] : memref<24x128xf32, #tpu.memory_space<vmem>>, vector<16x128xf32>
      %194 = vector.broadcast %79 : f32 to vector<16x128xf32>
      %195 = arith.mulf %194, %193 : vector<16x128xf32>
      %196 = arith.addf %192, %195 : vector<16x128xf32>
      %c0_76 = arith.constant 0 : index
      %c0_77 = arith.constant 0 : index
      %c2_78 = arith.constant 2 : index
      %197 = vector.load %arg6[%c0_76, %c0_77, %c2_78] : memref<2x24x256xf32, #tpu.memory_space<vmem>>, vector<1x24x128xf32>
      %198 = vector.shape_cast %197 : vector<1x24x128xf32> to vector<24x128xf32>
      %c0_79 = arith.constant 0 : index
      %c0_80 = arith.constant 0 : index
      %199 = vector.load %arg7[%c0_79, %c0_80] : memref<24x128xf32, #tpu.memory_space<vmem>>, vector<24x128xf32>
      tpu.vector_store %arg7[%c0_79, %c0_80], %198 {strides = array<i32>} : memref<24x128xf32, #tpu.memory_space<vmem>>, vector<24x128xf32>,
      %c0_81 = arith.constant 0 : index
      %c0_82 = arith.constant 0 : index
      %200 = vector.load %arg7[%c0_81, %c0_82] : memref<24x128xf32, #tpu.memory_space<vmem>>, vector<16x128xf32>
      %201 = vector.broadcast %38 : f32 to vector<16x128xf32>
      %202 = arith.mulf %201, %200 : vector<16x128xf32>
      %203 = arith.addf %196, %202 : vector<16x128xf32>
      %c1_83 = arith.constant 1 : index
      %c0_84 = arith.constant 0 : index
      %204 = vector.load %arg7[%c1_83, %c0_84] : memref<24x128xf32, #tpu.memory_space<vmem>>, vector<16x128xf32>
      %205 = vector.broadcast %45 : f32 to vector<16x128xf32>
      %206 = arith.mulf %205, %204 : vector<16x128xf32>
      %207 = arith.addf %203, %206 : vector<16x128xf32>
      %c2_85 = arith.constant 2 : index
      %c0_86 = arith.constant 0 : index
      %208 = vector.load %arg7[%c2_85, %c0_86] : memref<24x128xf32, #tpu.memory_space<vmem>>, vector<16x128xf32>
      %209 = vector.broadcast %52 : f32 to vector<16x128xf32>
      %210 = arith.mulf %209, %208 : vector<16x128xf32>
      %211 = arith.addf %207, %210 : vector<16x128xf32>
      %c3_87 = arith.constant 3 : index
      %c0_88 = arith.constant 0 : index
      %212 = vector.load %arg7[%c3_87, %c0_88] : memref<24x128xf32, #tpu.memory_space<vmem>>, vector<16x128xf32>
      %213 = vector.broadcast %59 : f32 to vector<16x128xf32>
      %214 = arith.mulf %213, %212 : vector<16x128xf32>
      %215 = arith.addf %211, %214 : vector<16x128xf32>
      %c4_89 = arith.constant 4 : index
      %c0_90 = arith.constant 0 : index
      %216 = vector.load %arg7[%c4_89, %c0_90] : memref<24x128xf32, #tpu.memory_space<vmem>>, vector<16x128xf32>
      %217 = vector.broadcast %66 : f32 to vector<16x128xf32>
      %218 = arith.mulf %217, %216 : vector<16x128xf32>
      %219 = arith.addf %215, %218 : vector<16x128xf32>
      %c5_91 = arith.constant 5 : index
      %c0_92 = arith.constant 0 : index
      %220 = vector.load %arg7[%c5_91, %c0_92] : memref<24x128xf32, #tpu.memory_space<vmem>>, vector<16x128xf32>
      %221 = vector.broadcast %73 : f32 to vector<16x128xf32>
      %222 = arith.mulf %221, %220 : vector<16x128xf32>
      %223 = arith.addf %219, %222 : vector<16x128xf32>
      %c6_93 = arith.constant 6 : index
      %c0_94 = arith.constant 0 : index
      %224 = vector.load %arg7[%c6_93, %c0_94] : memref<24x128xf32, #tpu.memory_space<vmem>>, vector<16x128xf32>
      %225 = vector.broadcast %80 : f32 to vector<16x128xf32>
      %226 = arith.mulf %225, %224 : vector<16x128xf32>
      %227 = arith.addf %223, %226 : vector<16x128xf32>
      %c0_95 = arith.constant 0 : index
      %c0_96 = arith.constant 0 : index
      %c3_97 = arith.constant 3 : index
      %228 = vector.load %arg6[%c0_95, %c0_96, %c3_97] : memref<2x24x256xf32, #tpu.memory_space<vmem>>, vector<1x24x128xf32>
      %229 = vector.shape_cast %228 : vector<1x24x128xf32> to vector<24x128xf32>
      %c0_98 = arith.constant 0 : index
      %c0_99 = arith.constant 0 : index
      %230 = vector.load %arg7[%c0_98, %c0_99] : memref<24x128xf32, #tpu.memory_space<vmem>>, vector<24x128xf32>
      tpu.vector_store %arg7[%c0_98, %c0_99], %229 {strides = array<i32>} : memref<24x128xf32, #tpu.memory_space<vmem>>, vector<24x128xf32>,
      %c0_100 = arith.constant 0 : index
      %c0_101 = arith.constant 0 : index
      %231 = vector.load %arg7[%c0_100, %c0_101] : memref<24x128xf32, #tpu.memory_space<vmem>>, vector<16x128xf32>
      %232 = vector.broadcast %39 : f32 to vector<16x128xf32>
      %233 = arith.mulf %232, %231 : vector<16x128xf32>
      %234 = arith.addf %227, %233 : vector<16x128xf32>
      %c1_102 = arith.constant 1 : index
      %c0_103 = arith.constant 0 : index
      %235 = vector.load %arg7[%c1_102, %c0_103] : memref<24x128xf32, #tpu.memory_space<vmem>>, vector<16x128xf32>
      %236 = vector.broadcast %46 : f32 to vector<16x128xf32>
      %237 = arith.mulf %236, %235 : vector<16x128xf32>
      %238 = arith.addf %234, %237 : vector<16x128xf32>
      %c2_104 = arith.constant 2 : index
      %c0_105 = arith.constant 0 : index
      %239 = vector.load %arg7[%c2_104, %c0_105] : memref<24x128xf32, #tpu.memory_space<vmem>>, vector<16x128xf32>
      %240 = vector.broadcast %53 : f32 to vector<16x128xf32>
      %241 = arith.mulf %240, %239 : vector<16x128xf32>
      %242 = arith.addf %238, %241 : vector<16x128xf32>
      %c3_106 = arith.constant 3 : index
      %c0_107 = arith.constant 0 : index
      %243 = vector.load %arg7[%c3_106, %c0_107] : memref<24x128xf32, #tpu.memory_space<vmem>>, vector<16x128xf32>
      %244 = vector.broadcast %60 : f32 to vector<16x128xf32>
      %245 = arith.mulf %244, %243 : vector<16x128xf32>
      %246 = arith.addf %242, %245 : vector<16x128xf32>
      %c4_108 = arith.constant 4 : index
      %c0_109 = arith.constant 0 : index
      %247 = vector.load %arg7[%c4_108, %c0_109] : memref<24x128xf32, #tpu.memory_space<vmem>>, vector<16x128xf32>
      %248 = vector.broadcast %67 : f32 to vector<16x128xf32>
      %249 = arith.mulf %248, %247 : vector<16x128xf32>
      %250 = arith.addf %246, %249 : vector<16x128xf32>
      %c5_110 = arith.constant 5 : index
      %c0_111 = arith.constant 0 : index
      %251 = vector.load %arg7[%c5_110, %c0_111] : memref<24x128xf32, #tpu.memory_space<vmem>>, vector<16x128xf32>
      %252 = vector.broadcast %74 : f32 to vector<16x128xf32>
      %253 = arith.mulf %252, %251 : vector<16x128xf32>
      %254 = arith.addf %250, %253 : vector<16x128xf32>
      %c6_112 = arith.constant 6 : index
      %c0_113 = arith.constant 0 : index
      %255 = vector.load %arg7[%c6_112, %c0_113] : memref<24x128xf32, #tpu.memory_space<vmem>>, vector<16x128xf32>
      %256 = vector.broadcast %81 : f32 to vector<16x128xf32>
      %257 = arith.mulf %256, %255 : vector<16x128xf32>
      %258 = arith.addf %254, %257 : vector<16x128xf32>
      %c0_114 = arith.constant 0 : index
      %c0_115 = arith.constant 0 : index
      %c4_116 = arith.constant 4 : index
      %259 = vector.load %arg6[%c0_114, %c0_115, %c4_116] : memref<2x24x256xf32, #tpu.memory_space<vmem>>, vector<1x24x128xf32>
      %260 = vector.shape_cast %259 : vector<1x24x128xf32> to vector<24x128xf32>
      %c0_117 = arith.constant 0 : index
      %c0_118 = arith.constant 0 : index
      %261 = vector.load %arg7[%c0_117, %c0_118] : memref<24x128xf32, #tpu.memory_space<vmem>>, vector<24x128xf32>
      tpu.vector_store %arg7[%c0_117, %c0_118], %260 {strides = array<i32>} : memref<24x128xf32, #tpu.memory_space<vmem>>, vector<24x128xf32>,
      %c0_119 = arith.constant 0 : index
      %c0_120 = arith.constant 0 : index
      %262 = vector.load %arg7[%c0_119, %c0_120] : memref<24x128xf32, #tpu.memory_space<vmem>>, vector<16x128xf32>
      %263 = vector.broadcast %40 : f32 to vector<16x128xf32>
      %264 = arith.mulf %263, %262 : vector<16x128xf32>
      %265 = arith.addf %258, %264 : vector<16x128xf32>
      %c1_121 = arith.constant 1 : index
      %c0_122 = arith.constant 0 : index
      %266 = vector.load %arg7[%c1_121, %c0_122] : memref<24x128xf32, #tpu.memory_space<vmem>>, vector<16x128xf32>
      %267 = vector.broadcast %47 : f32 to vector<16x128xf32>
      %268 = arith.mulf %267, %266 : vector<16x128xf32>
      %269 = arith.addf %265, %268 : vector<16x128xf32>
      %c2_123 = arith.constant 2 : index
      %c0_124 = arith.constant 0 : index
      %270 = vector.load %arg7[%c2_123, %c0_124] : memref<24x128xf32, #tpu.memory_space<vmem>>, vector<16x128xf32>
      %271 = vector.broadcast %54 : f32 to vector<16x128xf32>
      %272 = arith.mulf %271, %270 : vector<16x128xf32>
      %273 = arith.addf %269, %272 : vector<16x128xf32>
      %c3_125 = arith.constant 3 : index
      %c0_126 = arith.constant 0 : index
      %274 = vector.load %arg7[%c3_125, %c0_126] : memref<24x128xf32, #tpu.memory_space<vmem>>, vector<16x128xf32>
      %275 = vector.broadcast %61 : f32 to vector<16x128xf32>
      %276 = arith.mulf %275, %274 : vector<16x128xf32>
      %277 = arith.addf %273, %276 : vector<16x128xf32>
      %c4_127 = arith.constant 4 : index
      %c0_128 = arith.constant 0 : index
      %278 = vector.load %arg7[%c4_127, %c0_128] : memref<24x128xf32, #tpu.memory_space<vmem>>, vector<16x128xf32>
      %279 = vector.broadcast %68 : f32 to vector<16x128xf32>
      %280 = arith.mulf %279, %278 : vector<16x128xf32>
      %281 = arith.addf %277, %280 : vector<16x128xf32>
      %c5_129 = arith.constant 5 : index
      %c0_130 = arith.constant 0 : index
      %282 = vector.load %arg7[%c5_129, %c0_130] : memref<24x128xf32, #tpu.memory_space<vmem>>, vector<16x128xf32>
      %283 = vector.broadcast %75 : f32 to vector<16x128xf32>
      %284 = arith.mulf %283, %282 : vector<16x128xf32>
      %285 = arith.addf %281, %284 : vector<16x128xf32>
      %c6_131 = arith.constant 6 : index
      %c0_132 = arith.constant 0 : index
      %286 = vector.load %arg7[%c6_131, %c0_132] : memref<24x128xf32, #tpu.memory_space<vmem>>, vector<16x128xf32>
      %287 = vector.broadcast %82 : f32 to vector<16x128xf32>
      %288 = arith.mulf %287, %286 : vector<16x128xf32>
      %289 = arith.addf %285, %288 : vector<16x128xf32>
      %c0_133 = arith.constant 0 : index
      %c0_134 = arith.constant 0 : index
      %c5_135 = arith.constant 5 : index
      %290 = vector.load %arg6[%c0_133, %c0_134, %c5_135] : memref<2x24x256xf32, #tpu.memory_space<vmem>>, vector<1x24x128xf32>
      %291 = vector.shape_cast %290 : vector<1x24x128xf32> to vector<24x128xf32>
      %c0_136 = arith.constant 0 : index
      %c0_137 = arith.constant 0 : index
      %292 = vector.load %arg7[%c0_136, %c0_137] : memref<24x128xf32, #tpu.memory_space<vmem>>, vector<24x128xf32>
      tpu.vector_store %arg7[%c0_136, %c0_137], %291 {strides = array<i32>} : memref<24x128xf32, #tpu.memory_space<vmem>>, vector<24x128xf32>,
      %c0_138 = arith.constant 0 : index
      %c0_139 = arith.constant 0 : index
      %293 = vector.load %arg7[%c0_138, %c0_139] : memref<24x128xf32, #tpu.memory_space<vmem>>, vector<16x128xf32>
      %294 = vector.broadcast %41 : f32 to vector<16x128xf32>
      %295 = arith.mulf %294, %293 : vector<16x128xf32>
      %296 = arith.addf %289, %295 : vector<16x128xf32>
      %c1_140 = arith.constant 1 : index
      %c0_141 = arith.constant 0 : index
      %297 = vector.load %arg7[%c1_140, %c0_141] : memref<24x128xf32, #tpu.memory_space<vmem>>, vector<16x128xf32>
      %298 = vector.broadcast %48 : f32 to vector<16x128xf32>
      %299 = arith.mulf %298, %297 : vector<16x128xf32>
      %300 = arith.addf %296, %299 : vector<16x128xf32>
      %c2_142 = arith.constant 2 : index
      %c0_143 = arith.constant 0 : index
      %301 = vector.load %arg7[%c2_142, %c0_143] : memref<24x128xf32, #tpu.memory_space<vmem>>, vector<16x128xf32>
      %302 = vector.broadcast %55 : f32 to vector<16x128xf32>
      %303 = arith.mulf %302, %301 : vector<16x128xf32>
      %304 = arith.addf %300, %303 : vector<16x128xf32>
      %c3_144 = arith.constant 3 : index
      %c0_145 = arith.constant 0 : index
      %305 = vector.load %arg7[%c3_144, %c0_145] : memref<24x128xf32, #tpu.memory_space<vmem>>, vector<16x128xf32>
      %306 = vector.broadcast %62 : f32 to vector<16x128xf32>
      %307 = arith.mulf %306, %305 : vector<16x128xf32>
      %308 = arith.addf %304, %307 : vector<16x128xf32>
      %c4_146 = arith.constant 4 : index
      %c0_147 = arith.constant 0 : index
      %309 = vector.load %arg7[%c4_146, %c0_147] : memref<24x128xf32, #tpu.memory_space<vmem>>, vector<16x128xf32>
      %310 = vector.broadcast %69 : f32 to vector<16x128xf32>
      %311 = arith.mulf %310, %309 : vector<16x128xf32>
      %312 = arith.addf %308, %311 : vector<16x128xf32>
      %c5_148 = arith.constant 5 : index
      %c0_149 = arith.constant 0 : index
      %313 = vector.load %arg7[%c5_148, %c0_149] : memref<24x128xf32, #tpu.memory_space<vmem>>, vector<16x128xf32>
      %314 = vector.broadcast %76 : f32 to vector<16x128xf32>
      %315 = arith.mulf %314, %313 : vector<16x128xf32>
      %316 = arith.addf %312, %315 : vector<16x128xf32>
      %c6_150 = arith.constant 6 : index
      %c0_151 = arith.constant 0 : index
      %317 = vector.load %arg7[%c6_150, %c0_151] : memref<24x128xf32, #tpu.memory_space<vmem>>, vector<16x128xf32>
      %318 = vector.broadcast %83 : f32 to vector<16x128xf32>
      %319 = arith.mulf %318, %317 : vector<16x128xf32>
      %320 = arith.addf %316, %319 : vector<16x128xf32>
      %c0_152 = arith.constant 0 : index
      %c0_153 = arith.constant 0 : index
      %c6_154 = arith.constant 6 : index
      %321 = vector.load %arg6[%c0_152, %c0_153, %c6_154] : memref<2x24x256xf32, #tpu.memory_space<vmem>>, vector<1x24x128xf32>
      %322 = vector.shape_cast %321 : vector<1x24x128xf32> to vector<24x128xf32>
      %c0_155 = arith.constant 0 : index
      %c0_156 = arith.constant 0 : index
      %323 = vector.load %arg7[%c0_155, %c0_156] : memref<24x128xf32, #tpu.memory_space<vmem>>, vector<24x128xf32>
      tpu.vector_store %arg7[%c0_155, %c0_156], %322 {strides = array<i32>} : memref<24x128xf32, #tpu.memory_space<vmem>>, vector<24x128xf32>,
      %c0_157 = arith.constant 0 : index
      %c0_158 = arith.constant 0 : index
      %324 = vector.load %arg7[%c0_157, %c0_158] : memref<24x128xf32, #tpu.memory_space<vmem>>, vector<16x128xf32>
      %325 = vector.broadcast %42 : f32 to vector<16x128xf32>
      %326 = arith.mulf %325, %324 : vector<16x128xf32>
      %327 = arith.addf %320, %326 : vector<16x128xf32>
      %c1_159 = arith.constant 1 : index
      %c0_160 = arith.constant 0 : index
      %328 = vector.load %arg7[%c1_159, %c0_160] : memref<24x128xf32, #tpu.memory_space<vmem>>, vector<16x128xf32>
      %329 = vector.broadcast %49 : f32 to vector<16x128xf32>
      %330 = arith.mulf %329, %328 : vector<16x128xf32>
      %331 = arith.addf %327, %330 : vector<16x128xf32>
      %c2_161 = arith.constant 2 : index
      %c0_162 = arith.constant 0 : index
      %332 = vector.load %arg7[%c2_161, %c0_162] : memref<24x128xf32, #tpu.memory_space<vmem>>, vector<16x128xf32>
      %333 = vector.broadcast %56 : f32 to vector<16x128xf32>
      %334 = arith.mulf %333, %332 : vector<16x128xf32>
      %335 = arith.addf %331, %334 : vector<16x128xf32>
      %c3_163 = arith.constant 3 : index
      %c0_164 = arith.constant 0 : index
      %336 = vector.load %arg7[%c3_163, %c0_164] : memref<24x128xf32, #tpu.memory_space<vmem>>, vector<16x128xf32>
      %337 = vector.broadcast %63 : f32 to vector<16x128xf32>
      %338 = arith.mulf %337, %336 : vector<16x128xf32>
      %339 = arith.addf %335, %338 : vector<16x128xf32>
      %c4_165 = arith.constant 4 : index
      %c0_166 = arith.constant 0 : index
      %340 = vector.load %arg7[%c4_165, %c0_166] : memref<24x128xf32, #tpu.memory_space<vmem>>, vector<16x128xf32>
      %341 = vector.broadcast %70 : f32 to vector<16x128xf32>
      %342 = arith.mulf %341, %340 : vector<16x128xf32>
      %343 = arith.addf %339, %342 : vector<16x128xf32>
      %c5_167 = arith.constant 5 : index
      %c0_168 = arith.constant 0 : index
      %344 = vector.load %arg7[%c5_167, %c0_168] : memref<24x128xf32, #tpu.memory_space<vmem>>, vector<16x128xf32>
      %345 = vector.broadcast %77 : f32 to vector<16x128xf32>
      %346 = arith.mulf %345, %344 : vector<16x128xf32>
      %347 = arith.addf %343, %346 : vector<16x128xf32>
      %c6_169 = arith.constant 6 : index
      %c0_170 = arith.constant 0 : index
      %348 = vector.load %arg7[%c6_169, %c0_170] : memref<24x128xf32, #tpu.memory_space<vmem>>, vector<16x128xf32>
      %349 = vector.broadcast %84 : f32 to vector<16x128xf32>
      %350 = arith.mulf %349, %348 : vector<16x128xf32>
      %351 = arith.addf %347, %350 : vector<16x128xf32>
      %c1_171 = arith.constant 1 : index
      %c0_172 = arith.constant 0 : index
      %c0_173 = arith.constant 0 : index
      %352 = vector.load %arg6[%c1_171, %c0_172, %c0_173] : memref<2x24x256xf32, #tpu.memory_space<vmem>>, vector<1x24x128xf32>
      %353 = vector.shape_cast %352 : vector<1x24x128xf32> to vector<24x128xf32>
      %c0_174 = arith.constant 0 : index
      %c0_175 = arith.constant 0 : index
      %354 = vector.load %arg7[%c0_174, %c0_175] : memref<24x128xf32, #tpu.memory_space<vmem>>, vector<24x128xf32>
      tpu.vector_store %arg7[%c0_174, %c0_175], %353 {strides = array<i32>} : memref<24x128xf32, #tpu.memory_space<vmem>>, vector<24x128xf32>,
      %c0_176 = arith.constant 0 : index
      %c0_177 = arith.constant 0 : index
      %355 = vector.load %arg7[%c0_176, %c0_177] : memref<24x128xf32, #tpu.memory_space<vmem>>, vector<16x128xf32>
      %356 = vector.broadcast %85 : f32 to vector<16x128xf32>
      %357 = arith.mulf %356, %355 : vector<16x128xf32>
      %358 = arith.addf %351, %357 : vector<16x128xf32>
      %c1_178 = arith.constant 1 : index
      %c0_179 = arith.constant 0 : index
      %359 = vector.load %arg7[%c1_178, %c0_179] : memref<24x128xf32, #tpu.memory_space<vmem>>, vector<16x128xf32>
      %360 = vector.broadcast %92 : f32 to vector<16x128xf32>
      %361 = arith.mulf %360, %359 : vector<16x128xf32>
      %362 = arith.addf %358, %361 : vector<16x128xf32>
      %c2_180 = arith.constant 2 : index
      %c0_181 = arith.constant 0 : index
      %363 = vector.load %arg7[%c2_180, %c0_181] : memref<24x128xf32, #tpu.memory_space<vmem>>, vector<16x128xf32>
      %364 = vector.broadcast %99 : f32 to vector<16x128xf32>
      %365 = arith.mulf %364, %363 : vector<16x128xf32>
      %366 = arith.addf %362, %365 : vector<16x128xf32>
      %c3_182 = arith.constant 3 : index
      %c0_183 = arith.constant 0 : index
      %367 = vector.load %arg7[%c3_182, %c0_183] : memref<24x128xf32, #tpu.memory_space<vmem>>, vector<16x128xf32>
      %368 = vector.broadcast %106 : f32 to vector<16x128xf32>
      %369 = arith.mulf %368, %367 : vector<16x128xf32>
      %370 = arith.addf %366, %369 : vector<16x128xf32>
      %c4_184 = arith.constant 4 : index
      %c0_185 = arith.constant 0 : index
      %371 = vector.load %arg7[%c4_184, %c0_185] : memref<24x128xf32, #tpu.memory_space<vmem>>, vector<16x128xf32>
      %372 = vector.broadcast %113 : f32 to vector<16x128xf32>
      %373 = arith.mulf %372, %371 : vector<16x128xf32>
      %374 = arith.addf %370, %373 : vector<16x128xf32>
      %c5_186 = arith.constant 5 : index
      %c0_187 = arith.constant 0 : index
      %375 = vector.load %arg7[%c5_186, %c0_187] : memref<24x128xf32, #tpu.memory_space<vmem>>, vector<16x128xf32>
      %376 = vector.broadcast %120 : f32 to vector<16x128xf32>
      %377 = arith.mulf %376, %375 : vector<16x128xf32>
      %378 = arith.addf %374, %377 : vector<16x128xf32>
      %c6_188 = arith.constant 6 : index
      %c0_189 = arith.constant 0 : index
      %379 = vector.load %arg7[%c6_188, %c0_189] : memref<24x128xf32, #tpu.memory_space<vmem>>, vector<16x128xf32>
      %380 = vector.broadcast %127 : f32 to vector<16x128xf32>
      %381 = arith.mulf %380, %379 : vector<16x128xf32>
      %382 = arith.addf %378, %381 : vector<16x128xf32>
      %c1_190 = arith.constant 1 : index
      %c0_191 = arith.constant 0 : index
      %c1_192 = arith.constant 1 : index
      %383 = vector.load %arg6[%c1_190, %c0_191, %c1_192] : memref<2x24x256xf32, #tpu.memory_space<vmem>>, vector<1x24x128xf32>
      %384 = vector.shape_cast %383 : vector<1x24x128xf32> to vector<24x128xf32>
      %c0_193 = arith.constant 0 : index
      %c0_194 = arith.constant 0 : index
      %385 = vector.load %arg7[%c0_193, %c0_194] : memref<24x128xf32, #tpu.memory_space<vmem>>, vector<24x128xf32>
      tpu.vector_store %arg7[%c0_193, %c0_194], %384 {strides = array<i32>} : memref<24x128xf32, #tpu.memory_space<vmem>>, vector<24x128xf32>,
      %c0_195 = arith.constant 0 : index
      %c0_196 = arith.constant 0 : index
      %386 = vector.load %arg7[%c0_195, %c0_196] : memref<24x128xf32, #tpu.memory_space<vmem>>, vector<16x128xf32>
      %387 = vector.broadcast %86 : f32 to vector<16x128xf32>
      %388 = arith.mulf %387, %386 : vector<16x128xf32>
      %389 = arith.addf %382, %388 : vector<16x128xf32>
      %c1_197 = arith.constant 1 : index
      %c0_198 = arith.constant 0 : index
      %390 = vector.load %arg7[%c1_197, %c0_198] : memref<24x128xf32, #tpu.memory_space<vmem>>, vector<16x128xf32>
      %391 = vector.broadcast %93 : f32 to vector<16x128xf32>
      %392 = arith.mulf %391, %390 : vector<16x128xf32>
      %393 = arith.addf %389, %392 : vector<16x128xf32>
      %c2_199 = arith.constant 2 : index
      %c0_200 = arith.constant 0 : index
      %394 = vector.load %arg7[%c2_199, %c0_200] : memref<24x128xf32, #tpu.memory_space<vmem>>, vector<16x128xf32>
      %395 = vector.broadcast %100 : f32 to vector<16x128xf32>
      %396 = arith.mulf %395, %394 : vector<16x128xf32>
      %397 = arith.addf %393, %396 : vector<16x128xf32>
      %c3_201 = arith.constant 3 : index
      %c0_202 = arith.constant 0 : index
      %398 = vector.load %arg7[%c3_201, %c0_202] : memref<24x128xf32, #tpu.memory_space<vmem>>, vector<16x128xf32>
      %399 = vector.broadcast %107 : f32 to vector<16x128xf32>
      %400 = arith.mulf %399, %398 : vector<16x128xf32>
      %401 = arith.addf %397, %400 : vector<16x128xf32>
      %c4_203 = arith.constant 4 : index
      %c0_204 = arith.constant 0 : index
      %402 = vector.load %arg7[%c4_203, %c0_204] : memref<24x128xf32, #tpu.memory_space<vmem>>, vector<16x128xf32>
      %403 = vector.broadcast %114 : f32 to vector<16x128xf32>
      %404 = arith.mulf %403, %402 : vector<16x128xf32>
      %405 = arith.addf %401, %404 : vector<16x128xf32>
      %c5_205 = arith.constant 5 : index
      %c0_206 = arith.constant 0 : index
      %406 = vector.load %arg7[%c5_205, %c0_206] : memref<24x128xf32, #tpu.memory_space<vmem>>, vector<16x128xf32>
      %407 = vector.broadcast %121 : f32 to vector<16x128xf32>
      %408 = arith.mulf %407, %406 : vector<16x128xf32>
      %409 = arith.addf %405, %408 : vector<16x128xf32>
      %c6_207 = arith.constant 6 : index
      %c0_208 = arith.constant 0 : index
      %410 = vector.load %arg7[%c6_207, %c0_208] : memref<24x128xf32, #tpu.memory_space<vmem>>, vector<16x128xf32>
      %411 = vector.broadcast %128 : f32 to vector<16x128xf32>
      %412 = arith.mulf %411, %410 : vector<16x128xf32>
      %413 = arith.addf %409, %412 : vector<16x128xf32>
      %c1_209 = arith.constant 1 : index
      %c0_210 = arith.constant 0 : index
      %c2_211 = arith.constant 2 : index
      %414 = vector.load %arg6[%c1_209, %c0_210, %c2_211] : memref<2x24x256xf32, #tpu.memory_space<vmem>>, vector<1x24x128xf32>
      %415 = vector.shape_cast %414 : vector<1x24x128xf32> to vector<24x128xf32>
      %c0_212 = arith.constant 0 : index
      %c0_213 = arith.constant 0 : index
      %416 = vector.load %arg7[%c0_212, %c0_213] : memref<24x128xf32, #tpu.memory_space<vmem>>, vector<24x128xf32>
      tpu.vector_store %arg7[%c0_212, %c0_213], %415 {strides = array<i32>} : memref<24x128xf32, #tpu.memory_space<vmem>>, vector<24x128xf32>,
      %c0_214 = arith.constant 0 : index
      %c0_215 = arith.constant 0 : index
      %417 = vector.load %arg7[%c0_214, %c0_215] : memref<24x128xf32, #tpu.memory_space<vmem>>, vector<16x128xf32>
      %418 = vector.broadcast %87 : f32 to vector<16x128xf32>
      %419 = arith.mulf %418, %417 : vector<16x128xf32>
      %420 = arith.addf %413, %419 : vector<16x128xf32>
      %c1_216 = arith.constant 1 : index
      %c0_217 = arith.constant 0 : index
      %421 = vector.load %arg7[%c1_216, %c0_217] : memref<24x128xf32, #tpu.memory_space<vmem>>, vector<16x128xf32>
      %422 = vector.broadcast %94 : f32 to vector<16x128xf32>
      %423 = arith.mulf %422, %421 : vector<16x128xf32>
      %424 = arith.addf %420, %423 : vector<16x128xf32>
      %c2_218 = arith.constant 2 : index
      %c0_219 = arith.constant 0 : index
      %425 = vector.load %arg7[%c2_218, %c0_219] : memref<24x128xf32, #tpu.memory_space<vmem>>, vector<16x128xf32>
      %426 = vector.broadcast %101 : f32 to vector<16x128xf32>
      %427 = arith.mulf %426, %425 : vector<16x128xf32>
      %428 = arith.addf %424, %427 : vector<16x128xf32>
      %c3_220 = arith.constant 3 : index
      %c0_221 = arith.constant 0 : index
      %429 = vector.load %arg7[%c3_220, %c0_221] : memref<24x128xf32, #tpu.memory_space<vmem>>, vector<16x128xf32>
      %430 = vector.broadcast %108 : f32 to vector<16x128xf32>
      %431 = arith.mulf %430, %429 : vector<16x128xf32>
      %432 = arith.addf %428, %431 : vector<16x128xf32>
      %c4_222 = arith.constant 4 : index
      %c0_223 = arith.constant 0 : index
      %433 = vector.load %arg7[%c4_222, %c0_223] : memref<24x128xf32, #tpu.memory_space<vmem>>, vector<16x128xf32>
      %434 = vector.broadcast %115 : f32 to vector<16x128xf32>
      %435 = arith.mulf %434, %433 : vector<16x128xf32>
      %436 = arith.addf %432, %435 : vector<16x128xf32>
      %c5_224 = arith.constant 5 : index
      %c0_225 = arith.constant 0 : index
      %437 = vector.load %arg7[%c5_224, %c0_225] : memref<24x128xf32, #tpu.memory_space<vmem>>, vector<16x128xf32>
      %438 = vector.broadcast %122 : f32 to vector<16x128xf32>
      %439 = arith.mulf %438, %437 : vector<16x128xf32>
      %440 = arith.addf %436, %439 : vector<16x128xf32>
      %c6_226 = arith.constant 6 : index
      %c0_227 = arith.constant 0 : index
      %441 = vector.load %arg7[%c6_226, %c0_227] : memref<24x128xf32, #tpu.memory_space<vmem>>, vector<16x128xf32>
      %442 = vector.broadcast %129 : f32 to vector<16x128xf32>
      %443 = arith.mulf %442, %441 : vector<16x128xf32>
      %444 = arith.addf %440, %443 : vector<16x128xf32>
      %c1_228 = arith.constant 1 : index
      %c0_229 = arith.constant 0 : index
      %c3_230 = arith.constant 3 : index
      %445 = vector.load %arg6[%c1_228, %c0_229, %c3_230] : memref<2x24x256xf32, #tpu.memory_space<vmem>>, vector<1x24x128xf32>
      %446 = vector.shape_cast %445 : vector<1x24x128xf32> to vector<24x128xf32>
      %c0_231 = arith.constant 0 : index
      %c0_232 = arith.constant 0 : index
      %447 = vector.load %arg7[%c0_231, %c0_232] : memref<24x128xf32, #tpu.memory_space<vmem>>, vector<24x128xf32>
      tpu.vector_store %arg7[%c0_231, %c0_232], %446 {strides = array<i32>} : memref<24x128xf32, #tpu.memory_space<vmem>>, vector<24x128xf32>,
      %c0_233 = arith.constant 0 : index
      %c0_234 = arith.constant 0 : index
      %448 = vector.load %arg7[%c0_233, %c0_234] : memref<24x128xf32, #tpu.memory_space<vmem>>, vector<16x128xf32>
      %449 = vector.broadcast %88 : f32 to vector<16x128xf32>
      %450 = arith.mulf %449, %448 : vector<16x128xf32>
      %451 = arith.addf %444, %450 : vector<16x128xf32>
      %c1_235 = arith.constant 1 : index
      %c0_236 = arith.constant 0 : index
      %452 = vector.load %arg7[%c1_235, %c0_236] : memref<24x128xf32, #tpu.memory_space<vmem>>, vector<16x128xf32>
      %453 = vector.broadcast %95 : f32 to vector<16x128xf32>
      %454 = arith.mulf %453, %452 : vector<16x128xf32>
      %455 = arith.addf %451, %454 : vector<16x128xf32>
      %c2_237 = arith.constant 2 : index
      %c0_238 = arith.constant 0 : index
      %456 = vector.load %arg7[%c2_237, %c0_238] : memref<24x128xf32, #tpu.memory_space<vmem>>, vector<16x128xf32>
      %457 = vector.broadcast %102 : f32 to vector<16x128xf32>
      %458 = arith.mulf %457, %456 : vector<16x128xf32>
      %459 = arith.addf %455, %458 : vector<16x128xf32>
      %c3_239 = arith.constant 3 : index
      %c0_240 = arith.constant 0 : index
      %460 = vector.load %arg7[%c3_239, %c0_240] : memref<24x128xf32, #tpu.memory_space<vmem>>, vector<16x128xf32>
      %461 = vector.broadcast %109 : f32 to vector<16x128xf32>
      %462 = arith.mulf %461, %460 : vector<16x128xf32>
      %463 = arith.addf %459, %462 : vector<16x128xf32>
      %c4_241 = arith.constant 4 : index
      %c0_242 = arith.constant 0 : index
      %464 = vector.load %arg7[%c4_241, %c0_242] : memref<24x128xf32, #tpu.memory_space<vmem>>, vector<16x128xf32>
      %465 = vector.broadcast %116 : f32 to vector<16x128xf32>
      %466 = arith.mulf %465, %464 : vector<16x128xf32>
      %467 = arith.addf %463, %466 : vector<16x128xf32>
      %c5_243 = arith.constant 5 : index
      %c0_244 = arith.constant 0 : index
      %468 = vector.load %arg7[%c5_243, %c0_244] : memref<24x128xf32, #tpu.memory_space<vmem>>, vector<16x128xf32>
      %469 = vector.broadcast %123 : f32 to vector<16x128xf32>
      %470 = arith.mulf %469, %468 : vector<16x128xf32>
      %471 = arith.addf %467, %470 : vector<16x128xf32>
      %c6_245 = arith.constant 6 : index
      %c0_246 = arith.constant 0 : index
      %472 = vector.load %arg7[%c6_245, %c0_246] : memref<24x128xf32, #tpu.memory_space<vmem>>, vector<16x128xf32>
      %473 = vector.broadcast %130 : f32 to vector<16x128xf32>
      %474 = arith.mulf %473, %472 : vector<16x128xf32>
      %475 = arith.addf %471, %474 : vector<16x128xf32>
      %c1_247 = arith.constant 1 : index
      %c0_248 = arith.constant 0 : index
      %c4_249 = arith.constant 4 : index
      %476 = vector.load %arg6[%c1_247, %c0_248, %c4_249] : memref<2x24x256xf32, #tpu.memory_space<vmem>>, vector<1x24x128xf32>
      %477 = vector.shape_cast %476 : vector<1x24x128xf32> to vector<24x128xf32>
      %c0_250 = arith.constant 0 : index
      %c0_251 = arith.constant 0 : index
      %478 = vector.load %arg7[%c0_250, %c0_251] : memref<24x128xf32, #tpu.memory_space<vmem>>, vector<24x128xf32>
      tpu.vector_store %arg7[%c0_250, %c0_251], %477 {strides = array<i32>} : memref<24x128xf32, #tpu.memory_space<vmem>>, vector<24x128xf32>,
      %c0_252 = arith.constant 0 : index
      %c0_253 = arith.constant 0 : index
      %479 = vector.load %arg7[%c0_252, %c0_253] : memref<24x128xf32, #tpu.memory_space<vmem>>, vector<16x128xf32>
      %480 = vector.broadcast %89 : f32 to vector<16x128xf32>
      %481 = arith.mulf %480, %479 : vector<16x128xf32>
      %482 = arith.addf %475, %481 : vector<16x128xf32>
      %c1_254 = arith.constant 1 : index
      %c0_255 = arith.constant 0 : index
      %483 = vector.load %arg7[%c1_254, %c0_255] : memref<24x128xf32, #tpu.memory_space<vmem>>, vector<16x128xf32>
      %484 = vector.broadcast %96 : f32 to vector<16x128xf32>
      %485 = arith.mulf %484, %483 : vector<16x128xf32>
      %486 = arith.addf %482, %485 : vector<16x128xf32>
      %c2_256 = arith.constant 2 : index
      %c0_257 = arith.constant 0 : index
      %487 = vector.load %arg7[%c2_256, %c0_257] : memref<24x128xf32, #tpu.memory_space<vmem>>, vector<16x128xf32>
      %488 = vector.broadcast %103 : f32 to vector<16x128xf32>
      %489 = arith.mulf %488, %487 : vector<16x128xf32>
      %490 = arith.addf %486, %489 : vector<16x128xf32>
      %c3_258 = arith.constant 3 : index
      %c0_259 = arith.constant 0 : index
      %491 = vector.load %arg7[%c3_258, %c0_259] : memref<24x128xf32, #tpu.memory_space<vmem>>, vector<16x128xf32>
      %492 = vector.broadcast %110 : f32 to vector<16x128xf32>
      %493 = arith.mulf %492, %491 : vector<16x128xf32>
      %494 = arith.addf %490, %493 : vector<16x128xf32>
      %c4_260 = arith.constant 4 : index
      %c0_261 = arith.constant 0 : index
      %495 = vector.load %arg7[%c4_260, %c0_261] : memref<24x128xf32, #tpu.memory_space<vmem>>, vector<16x128xf32>
      %496 = vector.broadcast %117 : f32 to vector<16x128xf32>
      %497 = arith.mulf %496, %495 : vector<16x128xf32>
      %498 = arith.addf %494, %497 : vector<16x128xf32>
      %c5_262 = arith.constant 5 : index
      %c0_263 = arith.constant 0 : index
      %499 = vector.load %arg7[%c5_262, %c0_263] : memref<24x128xf32, #tpu.memory_space<vmem>>, vector<16x128xf32>
      %500 = vector.broadcast %124 : f32 to vector<16x128xf32>
      %501 = arith.mulf %500, %499 : vector<16x128xf32>
      %502 = arith.addf %498, %501 : vector<16x128xf32>
      %c6_264 = arith.constant 6 : index
      %c0_265 = arith.constant 0 : index
      %503 = vector.load %arg7[%c6_264, %c0_265] : memref<24x128xf32, #tpu.memory_space<vmem>>, vector<16x128xf32>
      %504 = vector.broadcast %131 : f32 to vector<16x128xf32>
      %505 = arith.mulf %504, %503 : vector<16x128xf32>
      %506 = arith.addf %502, %505 : vector<16x128xf32>
      %c1_266 = arith.constant 1 : index
      %c0_267 = arith.constant 0 : index
      %c5_268 = arith.constant 5 : index
      %507 = vector.load %arg6[%c1_266, %c0_267, %c5_268] : memref<2x24x256xf32, #tpu.memory_space<vmem>>, vector<1x24x128xf32>
      %508 = vector.shape_cast %507 : vector<1x24x128xf32> to vector<24x128xf32>
      %c0_269 = arith.constant 0 : index
      %c0_270 = arith.constant 0 : index
      %509 = vector.load %arg7[%c0_269, %c0_270] : memref<24x128xf32, #tpu.memory_space<vmem>>, vector<24x128xf32>
      tpu.vector_store %arg7[%c0_269, %c0_270], %508 {strides = array<i32>} : memref<24x128xf32, #tpu.memory_space<vmem>>, vector<24x128xf32>,
      %c0_271 = arith.constant 0 : index
      %c0_272 = arith.constant 0 : index
      %510 = vector.load %arg7[%c0_271, %c0_272] : memref<24x128xf32, #tpu.memory_space<vmem>>, vector<16x128xf32>
      %511 = vector.broadcast %90 : f32 to vector<16x128xf32>
      %512 = arith.mulf %511, %510 : vector<16x128xf32>
      %513 = arith.addf %506, %512 : vector<16x128xf32>
      %c1_273 = arith.constant 1 : index
      %c0_274 = arith.constant 0 : index
      %514 = vector.load %arg7[%c1_273, %c0_274] : memref<24x128xf32, #tpu.memory_space<vmem>>, vector<16x128xf32>
      %515 = vector.broadcast %97 : f32 to vector<16x128xf32>
      %516 = arith.mulf %515, %514 : vector<16x128xf32>
      %517 = arith.addf %513, %516 : vector<16x128xf32>
      %c2_275 = arith.constant 2 : index
      %c0_276 = arith.constant 0 : index
      %518 = vector.load %arg7[%c2_275, %c0_276] : memref<24x128xf32, #tpu.memory_space<vmem>>, vector<16x128xf32>
      %519 = vector.broadcast %104 : f32 to vector<16x128xf32>
      %520 = arith.mulf %519, %518 : vector<16x128xf32>
      %521 = arith.addf %517, %520 : vector<16x128xf32>
      %c3_277 = arith.constant 3 : index
      %c0_278 = arith.constant 0 : index
      %522 = vector.load %arg7[%c3_277, %c0_278] : memref<24x128xf32, #tpu.memory_space<vmem>>, vector<16x128xf32>
      %523 = vector.broadcast %111 : f32 to vector<16x128xf32>
      %524 = arith.mulf %523, %522 : vector<16x128xf32>
      %525 = arith.addf %521, %524 : vector<16x128xf32>
      %c4_279 = arith.constant 4 : index
      %c0_280 = arith.constant 0 : index
      %526 = vector.load %arg7[%c4_279, %c0_280] : memref<24x128xf32, #tpu.memory_space<vmem>>, vector<16x128xf32>
      %527 = vector.broadcast %118 : f32 to vector<16x128xf32>
      %528 = arith.mulf %527, %526 : vector<16x128xf32>
      %529 = arith.addf %525, %528 : vector<16x128xf32>
      %c5_281 = arith.constant 5 : index
      %c0_282 = arith.constant 0 : index
      %530 = vector.load %arg7[%c5_281, %c0_282] : memref<24x128xf32, #tpu.memory_space<vmem>>, vector<16x128xf32>
      %531 = vector.broadcast %125 : f32 to vector<16x128xf32>
      %532 = arith.mulf %531, %530 : vector<16x128xf32>
      %533 = arith.addf %529, %532 : vector<16x128xf32>
      %c6_283 = arith.constant 6 : index
      %c0_284 = arith.constant 0 : index
      %534 = vector.load %arg7[%c6_283, %c0_284] : memref<24x128xf32, #tpu.memory_space<vmem>>, vector<16x128xf32>
      %535 = vector.broadcast %132 : f32 to vector<16x128xf32>
      %536 = arith.mulf %535, %534 : vector<16x128xf32>
      %537 = arith.addf %533, %536 : vector<16x128xf32>
      %c1_285 = arith.constant 1 : index
      %c0_286 = arith.constant 0 : index
      %c6_287 = arith.constant 6 : index
      %538 = vector.load %arg6[%c1_285, %c0_286, %c6_287] : memref<2x24x256xf32, #tpu.memory_space<vmem>>, vector<1x24x128xf32>
      %539 = vector.shape_cast %538 : vector<1x24x128xf32> to vector<24x128xf32>
      %c0_288 = arith.constant 0 : index
      %c0_289 = arith.constant 0 : index
      %540 = vector.load %arg7[%c0_288, %c0_289] : memref<24x128xf32, #tpu.memory_space<vmem>>, vector<24x128xf32>
      tpu.vector_store %arg7[%c0_288, %c0_289], %539 {strides = array<i32>} : memref<24x128xf32, #tpu.memory_space<vmem>>, vector<24x128xf32>,
      %c0_290 = arith.constant 0 : index
      %c0_291 = arith.constant 0 : index
      %541 = vector.load %arg7[%c0_290, %c0_291] : memref<24x128xf32, #tpu.memory_space<vmem>>, vector<16x128xf32>
      %542 = vector.broadcast %91 : f32 to vector<16x128xf32>
      %543 = arith.mulf %542, %541 : vector<16x128xf32>
      %544 = arith.addf %537, %543 : vector<16x128xf32>
      %c1_292 = arith.constant 1 : index
      %c0_293 = arith.constant 0 : index
      %545 = vector.load %arg7[%c1_292, %c0_293] : memref<24x128xf32, #tpu.memory_space<vmem>>, vector<16x128xf32>
      %546 = vector.broadcast %98 : f32 to vector<16x128xf32>
      %547 = arith.mulf %546, %545 : vector<16x128xf32>
      %548 = arith.addf %544, %547 : vector<16x128xf32>
      %c2_294 = arith.constant 2 : index
      %c0_295 = arith.constant 0 : index
      %549 = vector.load %arg7[%c2_294, %c0_295] : memref<24x128xf32, #tpu.memory_space<vmem>>, vector<16x128xf32>
      %550 = vector.broadcast %105 : f32 to vector<16x128xf32>
      %551 = arith.mulf %550, %549 : vector<16x128xf32>
      %552 = arith.addf %548, %551 : vector<16x128xf32>
      %c3_296 = arith.constant 3 : index
      %c0_297 = arith.constant 0 : index
      %553 = vector.load %arg7[%c3_296, %c0_297] : memref<24x128xf32, #tpu.memory_space<vmem>>, vector<16x128xf32>
      %554 = vector.broadcast %112 : f32 to vector<16x128xf32>
      %555 = arith.mulf %554, %553 : vector<16x128xf32>
      %556 = arith.addf %552, %555 : vector<16x128xf32>
      %c4_298 = arith.constant 4 : index
      %c0_299 = arith.constant 0 : index
      %557 = vector.load %arg7[%c4_298, %c0_299] : memref<24x128xf32, #tpu.memory_space<vmem>>, vector<16x128xf32>
      %558 = vector.broadcast %119 : f32 to vector<16x128xf32>
      %559 = arith.mulf %558, %557 : vector<16x128xf32>
      %560 = arith.addf %556, %559 : vector<16x128xf32>
      %c5_300 = arith.constant 5 : index
      %c0_301 = arith.constant 0 : index
      %561 = vector.load %arg7[%c5_300, %c0_301] : memref<24x128xf32, #tpu.memory_space<vmem>>, vector<16x128xf32>
      %562 = vector.broadcast %126 : f32 to vector<16x128xf32>
      %563 = arith.mulf %562, %561 : vector<16x128xf32>
      %564 = arith.addf %560, %563 : vector<16x128xf32>
      %c6_302 = arith.constant 6 : index
      %c0_303 = arith.constant 0 : index
      %565 = vector.load %arg7[%c6_302, %c0_303] : memref<24x128xf32, #tpu.memory_space<vmem>>, vector<16x128xf32>
      %566 = vector.broadcast %133 : f32 to vector<16x128xf32>
      %567 = arith.mulf %566, %565 : vector<16x128xf32>
      %568 = arith.addf %564, %567 : vector<16x128xf32>
      %569 = arith.negf %568 : vector<16x128xf32>
      %570 = math.exp %569 : vector<16x128xf32>
      %cst_304 = arith.constant 1.000000e+00 : f32
      %571 = vector.broadcast %cst_304 : f32 to vector<16x128xf32>
      %572 = arith.addf %571, %570 : vector<16x128xf32>
      %573 = arith.divf %571, %572 : vector<16x128xf32>
      %c0_305 = arith.constant 0 : index
      %c0_306 = arith.constant 0 : index
      %c0_307 = arith.constant 0 : index
      %c0_308 = arith.constant 0 : index
      %574 = vector.load %arg4[%c0_305, %c0_306, %c0_307, %c0_308] : memref<1x1x16x128xf32, #tpu.memory_space<vmem>>, vector<1x1x16x128xf32>
      %575 = vector.shape_cast %574 : vector<1x1x16x128xf32> to vector<16x128xf32>
      %576 = vector.shape_cast %573 : vector<16x128xf32> to vector<1x1x16x128xf32>
      tpu.vector_store %arg4[%c0_305, %c0_306, %c0_307, %c0_308], %576 {strides = array<i32>} : memref<1x1x16x128xf32, #tpu.memory_space<vmem>>, vector<1x1x16x128xf32>,
    } else {
    }
    return
  }
  func.func @transform_0(%arg0: i32, %arg1: i32) -> i32 {
    %c0_i32 = arith.constant 0 : i32
    %c0_i32_0 = arith.constant 0 : i32
    return %c0_i32 : i32
  }
  func.func @transform_1(%arg0: i32, %arg1: i32) -> (i32, i32, i32, i32) {
    %c0_i32 = arith.constant 0 : i32
    %c0_i32_0 = arith.constant 0 : i32
    %c0_i32_1 = arith.constant 0 : i32
    return %arg0, %arg1, %c0_i32, %c0_i32_0 : i32, i32, i32, i32
  }
  func.func @transform_2(%arg0: i32, %arg1: i32) -> (i32, i32, i32, i32) {
    %c0_i32 = arith.constant 0 : i32
    %c0_i32_0 = arith.constant 0 : i32
    %c0_i32_1 = arith.constant 0 : i32
    %c0_i32_2 = arith.constant 0 : i32
    return %arg0, %c0_i32, %c0_i32_0, %c0_i32_1 : i32, i32, i32, i32
  }
}

</mosaic_0001>

<bundles_post_ra>
// kernel: tpu_custom_call.1
= control target key start
LH: loop header
LB: loop body
LE: loop exit
PB: predicated region body
PF: predicated region fallthrough
CT: control target
= control target key end

     0   :  { %s2930_s0 = inlined_call_operand.hbm [shape: f32[98], index: 0, kind: input, shape index: {}]   ;;  %s2931_s1 = inlined_call_operand.hbm [shape: f32[2,4,16,16], index: 1, kind: input, shape index: {}]   ;;  %s2932_s2 = inlined_call_operand.hbm [shape: f32[2,1,16,128], index: 2, kind: output, shape index: {}]  }
   0x1   :  { %2933 = sst [smem:[#allocation14_spill]] %s2930_s0 }
   0x2   :  { %7 = vsyncpa [#allocation8], 0 }
   0x3   :  { %8 = vsyncpa [#allocation6], 0 }
   0x4   :  { %10 = vsyncpa [#allocation6 + $0x1], 0 }
   0x5   :  { %11 = vsyncpa [#allocation7], 0 }
   0x6   :  { %13 = vsyncpa [#allocation7 + $0x1], 0  ;;  %s2062_s9 = smov 0   ;;  %s2064_s10 = smov 0  }
   0x7   :  { %s2066_s11 = smov 0   ;;  %s2068_s12 = smov 0  }
   0x8   :  { %s2070_s13 = smov 0   ;;  %s2072_s14 = smov 0  }
   0x9 LB: > { %s1633_s15 = sadd.s32 4294967295, %s2029_s14   ;;  %s1634_s16 = sadd.s32 4294967294, %s2029_s14   ;;  %s2029_s14 = sphi %s2072_s14, %s19_s14   ;;  %s2025_s13 = sphi %s2070_s13, %s2947_s13   ;;  %s2021_s12 = sphi %s2068_s12, %s2946_s12   ;;  %s2017_s11 = sphi %s2066_s11, %s2945_s11   ;;  %s2013_s10 = sphi %s2064_s10, %s2944_s10   ;;  %s2009_s9 = sphi %s2062_s9, %s2943_s9  }
   0xa   : > { %s61_s17 = sadd.s32 1, %s2017_s11  ;;  %p68_p0 = scmp.ne.s32.totalorder %s2017_s11, %s2013_s10 }
   0xb   : > { %p69_p1 = scmp.eq.s32.totalorder %s2029_s14, 0  ;;  %p74_p2 = scmp.ne.s32.totalorder %s2013_s10, %s2009_s9 }
   0xc   : > { %p2100_p3 = scmp.eq.s32.totalorder %s1633_s15, 0  ;;  %p98_p4 = scmp.eq.s32.totalorder %s1633_s15, 1 }
   0xd   : > { %p70_p5 = por %p69_p1, %p68_p0  ;;  %p104_p6 = scmp.eq.s32.totalorder %s1634_s16, 1 }
   0xe   : > { %p2106_p7 = por %p2100_p3, %p74_p2  ;;  %p2110_p8 = por %p98_p4, %p68_p0 }
   0xf   : > { %p2114_p9 = por %p104_p6, %p74_p2  ;;  %p1635_p10 = scmp.ge.s32.totalorder %s2029_s14, 1 }
  0x10   : > { %p111_p11 = scmp.lt.s32.totalorder %s2029_s14, 3  ;;  %p1772_p1 = scmp.lt.s32.totalorder %s2029_s14, 2 }
  0x11   : > { %s2937_s21 = scalar_select %p2114_p9, 1, 0 }
  0x12   : > { %p2121_p13 = pnand %p1635_p10, %p111_p11  ;;  %s133_s23 = sand.u32 1, %s2017_s11  }
  0x13   : > { %p2129_p2 = pnand %p1772_p1, %p70_p5  ;;  %s31_s25 = sadd.s32 1, %s2025_s13 }
  0x14   : > { %p1759_p0 = pneg %p2121_p13  ;;  %s1638_s26 = sshll.u32 %s133_s23, 6 }
  0x15   : > { %p33_p6 = scmp.ge.s32.totalorder %s31_s25, 2  ;;  %s2031_s27 = smov [#allocation5]  }
  0x16   : > { %p1760_p4 = pnand %p1759_p0, %p2100_p3  ;;  %s2940_s0 = sld [smem:[#allocation14_spill]] }
  0x17   : > { %s2949_s25 = smov (%p33_p6, %s31_s25), 0  ;;  %s1749_s30 = sshll.u32 %s2025_s13, 10 }
  0x18   : > { %s56_s3 = ssub.s32 %s2025_s13, %s2949_s25  ;;  %s146_s6 = scalar_lea.hbm %s2931_s1, %s1749_s30 }
  0x19   : > { %p59_p5 = scmp.eq.s32.totalorder %s56_s3, 0  ;;  %s137_s7 = scalar_lea.vmem [#allocation9], %s1638_s26 }
  0x1a   : > { %s147_s8 = sshll.u32 %s137_s7, 4  ;;  %s134_s16 = scalar_lea.sflag [#allocation6], %s133_s23  ;;  %s148_s8 = int_to_ptr.vmem [resolvable:$true] %s147_s8 }
  0x1b   : > { %s2150_s15 = scalar_select %p59_p5, %s2017_s11, %s61_s17  }
  0x1c   : > { %1762 = dma.hbm_to_smem (!%p1760_p4), %s2940_s0, 16, %s2031_s27, [#allocation8]  }
  0x1d   : > { %p1919_p10 = pneg %p2129_p2  ;;  %s1930_s27 = scalar_lea.vmem %s148_s8, 1024 }
  0x1e   : > { %p1931_p11 = scmp.ne.s32.totalorder %s148_s8, %s1930_s27  ;;  %s2032_s28 = smov [#allocation9]  }
  0x1f   : > { %s1935_s29 = sshll.u32 %s2032_s28, 4  ;;  %s1936_s29 = int_to_ptr.vmem [resolvable:$false] %s1935_s29 }
  0x20   : > { %p1933_p1 = pnand %p1931_p11, %p1919_p10  ;;  %s1937_s0 = scalar_lea.vmem %s1936_s29, 2048 }
  0x21   : > { %p1938_p4 = scmp.lt.s32.totalorder %s148_s8, %s1936_s29  ;;  %p1939_p6 = scmp.lt.s32.totalorder %s1937_s0, %s1930_s27 }
  0x22   : > { %p1934_p0 = pneg %p1933_p1 }
  0x23   : > { %p1940_p12 = por %p1939_p6, %p1938_p4 }
  0x25   : > { %p1941_p9 = pnand %p1940_p12, %p1934_p0 }
  0x27   : > { %1944 = shalt.err (!%p1941_p9)
}
  0x28   : > { %s2033_s26 = smov 128   ;;  %s2034_s17 = smov 8  }
  0x29   : > { %1766 = dma.hbm_to_vmem [thread:$0]  (!%p2129_p2), %s146_s6, 1024, %s148_s8, %s134_s16, %s2033_s26, %s2033_s26, %s2034_s17  }
  0x2a   : > { %159 = sbr.rel (%p2121_p13) target bundleno = 616 (0x268), region = 28 }
  0x2f   : > { %1996 = dma.done.wait (%p2100_p3), [#allocation8], 16  }
  0x30   : > { %1998 = vsyncadd (%p2100_p3), [#allocation8], 4294967280  ;;  %s2163_s0 = sand.u32 1, %s2013_s10  }
  0x31   : > { %s1643_s23 = sshll.u32 %s2163_s0, 6  ;;  %s166_s30 = scalar_lea.sflag [#allocation6], %s2163_s0 }
  0x32   : > { %s169_s3 = scalar_lea.vmem [#allocation9], %s1643_s23 }
  0x33   : > { %2000 = dma.done.wait (%p2106_p7), %s166_s30, 1024  }
  0x34   : > { %2002 = vsyncadd (%p2106_p7), %s166_s30, 4294966272 }
  0x35   : > { %174 = sfence }
  0x36   : > { %v2171_v0 = vld [vmem:[%s169_s3 + $0x8] sm:$0xff]  ;;  %v2173_v1 = vld [vmem:[%s169_s3 + $0x18] sm:$0xff]  ;;  %vm200_vm0 = vcmask 130048   ;;  %v2035_v7 = vmov 0.0   ;;  %v192_v8 = vld [vmem:[%s169_s3] sm:$0xff]  ;;  %vm272_vm1 = vcmask 1042432  }
  0x37   : > { %v2175_v2 = vld [vmem:[%s169_s3 + $0x28] sm:$0xff]  ;;  %v199_v3 = vld [vmem:[%s169_s3 + $0x38] sm:$0xff]  ;;  %v208_v4 = vsel %vm200_vm0, %v2171_v0, 0.0  ;;  %v209_v5 = vsel %vm200_vm0, %v2173_v1, 0.0  ;;  %234 = vst.msk [vmem:[#allocation2 + $0x8] sm:$0xff] %vm200_vm0, %v2035_v7  ;;  %233 = vst.msk [vmem:[#allocation2] sm:$0xff] %vm200_vm0, %v2035_v7 }
  0x38   : > { %v211_v6 = vsel %vm200_vm0, %v2175_v2, 0.0  ;;  %254 = vst [vmem:[#allocation3] sm:$0xff] %v2035_v7  ;;  %255 = vst [vmem:[#allocation3 + $0x8] sm:$0xff] %v2035_v7  ;;  %v194_v9 = vld [vmem:[%s169_s3 + $0x10] sm:$0xff]  ;;  %v210_v10 = vadd.f32 %v209_v5, %v208_v4  ;;  %v196_v11 = vld [vmem:[%s169_s3 + $0x20] sm:$0xff]  ;;  %v201_v13 = vsel %vm200_vm0, %v192_v8, 0.0 }
  0x39   : > { %256 = vst [vmem:[#allocation3 + $0x10] sm:$0xff] %v2035_v7  ;;  %258 = vst [vmem:[#allocation3 + $0x20] sm:$0xff] %v2035_v7  ;;  %v198_v12 = vld [vmem:[%s169_s3 + $0x30] sm:$0xff]  ;;  %v213_v14 = vsel %vm200_vm0, %v199_v3, 0.0  ;;  %v202_v15 = vsel %vm200_vm0, %v194_v9, 0.0  ;;  %v204_v16 = vsel %vm200_vm0, %v196_v11, 0.0 }
  0x3a   : > { %260 = vst [vmem:[#allocation3 + $0x30] sm:$0xff] %v2035_v7  ;;  %262 = vst [vmem:[#allocation3 + $0x40] sm:$0xff] %v2035_v7  ;;  %v212_v17 = vadd.f32 %v211_v6, %v210_v10  ;;  %v203_v18 = vadd.f32 %v202_v15, %v201_v13  ;;  %v206_v19 = vsel %vm200_vm0, %v198_v12, 0.0  ;;  %s2036_s18 = smov 3   ;;  %v2037_v33 = vmov -inf   ;;  %s2038_s19 = smov 127  }
  0x3b   : > { %264 = vst [vmem:[#allocation3 + $0x50] sm:$0xff] %v2035_v7  ;;  %236 = vst.msk [vmem:[#allocation2 + $0x10] sm:$0xff] %vm200_vm0, %v2037_v33  ;;  %v219_v34 = vsel %vm200_vm0, %v198_v12, -inf  ;;  %v215_v36 = vsel %vm200_vm0, %v192_v8, -inf  ;;  %v216_v37 = vsel %vm200_vm0, %v194_v9, -inf  ;;  %v217_v38 = vsel %vm200_vm0, %v196_v11, -inf }
  0x3c   : > { %v214_v20 = vadd.f32 %v213_v14, %v212_v17  ;;  %v205_v21 = vadd.f32 %v204_v16, %v203_v18  ;;  %237 = vst.msk [vmem:[#allocation2 + $0x18] sm:$0xff] %vm200_vm0, %v2037_v33  ;;  %v218_v39 = vmax.f32 %v215_v36, %v217_v38  ;;  %v220_v40 = vmax.f32 %v216_v37, %v219_v34  ;;  %s2039_s22 = smov 126   ;;  %s2040_s24 = smov 125  }
  0x3d   : > { %v226_v41 = vsel %vm200_vm0, %v199_v3, -inf  ;;  %v222_v44 = vsel %vm200_vm0, %v2171_v0, -inf  ;;  %v223_v45 = vsel %vm200_vm0, %v2173_v1, -inf  ;;  %v224_v46 = vsel %vm200_vm0, %v2175_v2, -inf  ;;  %s2041_s4 = smov 124   ;;  %s2042_s5 = smov 123  }
  0x3e   : > { %v239_v22 = vld [vmem:[#allocation2 + $0x8] sm:$0xff]  ;;  %v207_v23 = vadd.f32 %v206_v19, %v205_v21  ;;  %v238_v24 = vld [vmem:[#allocation2] sm:$0xff]  ;;  %v221_v42 = vmax.f32 %v218_v39, %v220_v40  ;;  %v225_v48 = vmax.f32 %v222_v44, %v224_v46  ;;  %v227_v49 = vmax.f32 %v223_v45, %v226_v41  ;;  %s2043_s6 = smov 122   ;;  %s1651_s7 = sld [smem:[#allocation5 + $0x7]] }
  0x3f   : > { %v241_v25 = vadd.f32 %v239_v22, %v214_v20  ;;  %vm289_vm2 = vcmask 149528   ;;  %vm285_vm3 = vcmask 154651   ;;  %vm287_vm4 = vcmask 154648   ;;  %s311_s8 = sld [smem:[#allocation5]] }
  0x40   : > { %v240_v26 = vadd.f32 %v238_v24, %v207_v23  ;;  %v228_v50 = vmax.f32 %v225_v48, %v227_v49  ;;  %s1658_s16 = sld [smem:[#allocation5 + $0xe]]  ;;  %vm488_vm5 = vcmask 1039360   ;;  %vm571_vm6 = vcmask 1031168  }
  0x41   : > { %243 = vst.msk [vmem:[#allocation2 + $0x8] sm:$0xff] %vm200_vm0, %v241_v25  ;;  %s2271_s27 = sld [smem:[#allocation5 + $0x15]]  ;;  %vm654_vm7 = vcmask 1022976   ;;  %vm737_vm8 = vcmask 1014784   ;;  %vm820_vm9 = vcmask 1006592   ;;  %vm903_vm10 = vcmask 998400  }
  0x42   : > { %242 = vst.msk [vmem:[#allocation2] sm:$0xff] %vm200_vm0, %v240_v26  ;;  %v245_v43 = vld [vmem:[#allocation2 + $0x10] sm:$0xff]  ;;  %s2273_s28 = sld [smem:[#allocation5 + $0x1c]] }
  0x43   : > { %v247_v47 = vmax.f32 %v245_v43, %v221_v42  ;;  %v246_v51 = vld [vmem:[#allocation2 + $0x18] sm:$0xff]  ;;  %s2275_s29 = sld [smem:[#allocation5 + $0x23]] }
  0x44   : > { %v248_v52 = vmax.f32 %v246_v51, %v228_v50  ;;  %v424_v1 = vstv %s1651_s7  ;;  %s2278_s26 = sld [smem:[#allocation5 + $0x2a]] }
  0x45   : > { %249 = vst.msk [vmem:[#allocation2 + $0x10] sm:$0xff] %vm200_vm0, %v247_v47  ;;  %v417_v2 = vstv %s311_s8  ;;  %s2280_s17 = sld [smem:[#allocation5 + $0x1]] }
  0x46   : > { %250 = vst.msk [vmem:[#allocation2 + $0x18] sm:$0xff] %vm200_vm0, %v248_v52  ;;  %v431_v8 = vstv %s1658_s16  ;;  %s2285_s23 = sld [smem:[#allocation5 + $0x8]] }
  0x47   : > { %v438_v16 = vstv %s2271_s27  ;;  %s2288_s30 = sld [smem:[#allocation5 + $0xf]] }
  0x48   : > { %v267_v27 = vld [vmem:[#allocation2 + $0x8] sm:$0xff]  ;;  %v445_v24 = vstv %s2273_s28  ;;  %s2292_s3 = sld [smem:[#allocation5 + $0x16]] }
  0x49   : > { %v269_v28 = vmul.f32 0.25, %v267_v27  ;;  %v266_v29 = vld [vmem:[#allocation2] sm:$0xff]  ;;  %v452_v36 = vstv %s2275_s29  ;;  %s2297_s7 = sld [smem:[#allocation5 + $0x24]] }
  0x4a   : > { %v268_v30 = vmul.f32 0.25, %v266_v29  ;;  %v459_v46 = vstv %s2278_s26  ;;  %s2300_s8 = sld [smem:[#allocation5 + $0x2b]] }
  0x4b   : > { %v274_v31 = vrot.slane %v269_v28, 5  ;;  %v500_v47 = vstv %s2280_s17  ;;  %s2303_s16 = sld [smem:[#allocation5 + $0x2]] }
  0x4c   : > { %v273_v32 = vrot.slane %v268_v30, 5  ;;  %v291_v59 = vld [vmem:[#allocation2 + $0x10] sm:$0xff]  ;;  %s2309_s27 = sld [smem:[#allocation5 + $0x9]] }
  0x4d   : > { %280 = vrot.lane.b32.xlu1 %v274_v31, %s2036_s18  ;;  %v295_v60 = vrot.slane %v291_v59, 5  ;;  %v292_v61 = vld [vmem:[#allocation2 + $0x18] sm:$0xff]  ;;  %s2313_s28 = sld [smem:[#allocation5 + $0x10]] }
  0x4e   : > { %276 = vrot.lane.b32.xlu0 %v273_v32, %s2036_s18  ;;  %v275_v35 = vsel %vm272_vm1, %v273_v32, %v274_v31  ;;  %v296_v62 = vrot.slane %v292_v61, 5  ;;  %v514_v61 = vstv %s2288_s30  ;;  %s2320_s29 = sld [smem:[#allocation5 + $0x17]] }
  0x4f   : > { %s2323_s26 = sld [smem:[#allocation5 + $0x1e]] }
  0x50   : > { %v297_v63 = vsel %vm272_vm1, %v295_v60, %v296_v62  ;;  %s2328_s17 = sld [smem:[#allocation5 + $0x25]] }
  0x51   : > { %s2341_s30 = sld [smem:[#allocation5 + $0x3]] }
  0x52   : > { %278 = vrot.lane.b32.xlu0 %v275_v35, %s2036_s18 }
  0x56   : > { %1838 = vrot.lane.b32.xlu0 %v2035_v7, %s2038_s19 }
  0xbf   : > { %v281_v53 = vpop.permute.xlu1 %280 }
  0xc0   : > { %290 = vst.msk [vmem:[#allocation3 + $0x20] sm:$0x7] %vm289_vm2, %v281_v53  ;;  %v277_v54 = vpop.permute.xlu0 %276 }
  0xc1   : > { %286 = vst.msk [vmem:[#allocation3] sm:$0xf8] %vm285_vm3, %v277_v54 }
  0xc4   : > { %v279_v55 = vpop.permute.xlu0 %278 }
  0xc5   : > { %288 = vst.msk [vmem:[#allocation3 + $0x10] sm:$0xff] %vm287_vm4, %v279_v55 }
  0xc7   : > { %v411_v56 = vld [vmem:[#allocation3 + $0x20] sm:$0xff] }
  0xc8   : > { %414 = vst [vmem:[#allocation4 + $0x10] sm:$0xff] %v411_v56  ;;  %v409_v57 = vld [vmem:[#allocation3] sm:$0xff]  ;;  %484 = vrot.lane.b32.xlu0 %v411_v56, %s2038_s19  ;;  %v1839_v11 = vpop.permute.xlu0 %1838 }
  0xc9   : > { %412 = vst [vmem:[#allocation4] sm:$0xff] %v409_v57  ;;  %476 = vrot.lane.b32.xlu1 %v409_v57, %s2038_s19  ;;  %v418_v5 = vmul.f32 %v417_v2, %v409_v57  ;;  %v1840_v19 = vunpack.i.l.bf16 %v1839_v11  ;;  %v1841_v35 = vunpack.i.h.bf16 %v1839_v11 }
  0xcc   : > { %v410_v58 = vld [vmem:[#allocation3 + $0x10] sm:$0xff]  ;;  %559 = vrot.lane.b32.xlu0 %v409_v57, %s2039_s22 }
  0xcd   : > { %413 = vst [vmem:[#allocation4 + $0x8] sm:$0xff] %v410_v58  ;;  %480 = vrot.lane.b32.xlu1 %v410_v58, %s2038_s19  ;;  %v419_v12 = vmul.f32 %v417_v2, %v410_v58 }
  0xd0   : > { %563 = vrot.lane.b32.xlu0 %v410_v58, %s2039_s22 }
  0xd1   : > { %486 = vrot.lane.b32.xlu1 %v2035_v7, %s2038_s19 }
  0xd4   : > { %569 = vrot.lane.b32.xlu0 %v2035_v7, %s2039_s22  ;;  %v422_v0 = vld [vmem:[#allocation4 + $0x1] sm:$0xff]  ;;  %v423_v4 = vld [vmem:[#allocation4 + $0x9] sm:$0xff] }
  0xd5   : > { %1843 = vrot.lane.b32.xlu1 %v2035_v7, %s2039_s22  ;;  %v425_v3 = vmul.f32 %v424_v1, %v422_v0  ;;  %v429_v6 = vld [vmem:[#allocation4 + $0x2] sm:$0xff]  ;;  %v426_v9 = vmul.f32 %v424_v1, %v423_v4  ;;  %v430_v14 = vld [vmem:[#allocation4 + $0xa] sm:$0xff] }
  0xd6   : > { %v432_v13 = vmul.f32 %v431_v8, %v429_v6  ;;  %v436_v15 = vld [vmem:[#allocation4 + $0x3] sm:$0xff]  ;;  %v433_v20 = vmul.f32 %v431_v8, %v430_v14  ;;  %v437_v22 = vld [vmem:[#allocation4 + $0xb] sm:$0xff]  ;;  %v521_v8 = vstv %s2292_s3  ;;  %s2358_s3 = sld [smem:[#allocation5 + $0xa]] }
  0xd7   : > { %v427_v10 = vadd.f32 %v425_v3, %v418_v5  ;;  %v428_v17 = vadd.f32 %v426_v9, %v419_v12  ;;  %v439_v21 = vmul.f32 %v438_v16, %v436_v15  ;;  %v443_v23 = vld [vmem:[#allocation4 + $0x4] sm:$0xff]  ;;  %v440_v32 = vmul.f32 %v438_v16, %v437_v22  ;;  %v444_v34 = vld [vmem:[#allocation4 + $0xc] sm:$0xff] }
  0xd8   : > { %1848 = vrot.lane.b32.xlu0 %v2035_v7, %s2040_s24  ;;  %v450_v29 = vld [vmem:[#allocation4 + $0x5] sm:$0xff]  ;;  %v446_v33 = vmul.f32 %v445_v24, %v443_v23  ;;  %v451_v42 = vld [vmem:[#allocation4 + $0xd] sm:$0xff]  ;;  %v447_v44 = vmul.f32 %v445_v24, %v444_v34 }
  0xd9   : > { %567 = vrot.lane.b32.xlu1 %v411_v56, %s2039_s22  ;;  %v434_v18 = vadd.f32 %v432_v13, %v427_v10  ;;  %v435_v26 = vadd.f32 %v433_v20, %v428_v17  ;;  %v457_v30 = vld [vmem:[#allocation4 + $0x6] sm:$0xff]  ;;  %v458_v43 = vld [vmem:[#allocation4 + $0xe] sm:$0xff]  ;;  %v453_v45 = vmul.f32 %v452_v36, %v450_v29  ;;  %v454_v53 = vmul.f32 %v452_v36, %v451_v42 }
  0xda   : > { %v460_v54 = vmul.f32 %v459_v46, %v457_v30  ;;  %v461_v1 = vmul.f32 %v459_v46, %v458_v43  ;;  %v583_v43 = vstv %s2303_s16  ;;  %s2385_s16 = sld [smem:[#allocation5 + $0x26]] }
  0xdb   : > { %v441_v28 = vadd.f32 %v439_v21, %v434_v18  ;;  %v442_v38 = vadd.f32 %v440_v32, %v435_v26 }
  0xdc   : > { %650 = vrot.lane.b32.xlu0 %v411_v56, %s2040_s24 }
  0xdd   : > { %642 = vrot.lane.b32.xlu1 %v409_v57, %s2040_s24  ;;  %v448_v39 = vadd.f32 %v446_v33, %v441_v28  ;;  %v449_v49 = vadd.f32 %v447_v44, %v442_v38  ;;  %v542_v38 = vstv %s2300_s8  ;;  %s2377_s8 = sld [smem:[#allocation5 + $0x1f]] }
  0xdf   : > { %v455_v50 = vadd.f32 %v453_v45, %v448_v39 }
  0xe0   : > { %298 = vrot.lane.b32.xlu0 %v295_v60, %s2036_s18 }
  0xe1   : > { %652 = vrot.lane.b32.xlu1 %v2035_v7, %s2040_s24  ;;  %v462_v59 = vadd.f32 %v460_v54, %v455_v50 }
  0xe4   : > { %302 = vrot.lane.b32.xlu0 %v296_v62, %s2036_s18 }
  0xe5   : > { %646 = vrot.lane.b32.xlu1 %v410_v58, %s2040_s24 }
  0xe8   : > { %1853 = vrot.lane.b32.xlu0 %v2035_v7, %s2041_s4 }
  0xe9   : > { %300 = vrot.lane.b32.xlu1 %v297_v63, %s2036_s18  ;;  %s2295_s18 = sld [smem:[#allocation5 + $0x1d]] }
  0xec   : > { %733 = vrot.lane.b32.xlu0 %v411_v56, %s2041_s4 }
  0xed   : > { %725 = vrot.lane.b32.xlu1 %v409_v57, %s2041_s4 }
  0xef   : > { %v528_v21 = vstv %s2295_s18  ;;  %s2364_s18 = sld [smem:[#allocation5 + $0x11]] }
  0xf0   : > { %808 = vrot.lane.b32.xlu0 %v409_v57, %s2042_s5 }
  0xf1   : > { %729 = vrot.lane.b32.xlu1 %v410_v58, %s2041_s4 }
  0xf4   : > { %812 = vrot.lane.b32.xlu0 %v410_v58, %s2042_s5 }
  0xf5   : > { %735 = vrot.lane.b32.xlu1 %v2035_v7, %s2041_s4 }
  0xf8   : > { %818 = vrot.lane.b32.xlu0 %v2035_v7, %s2042_s5 }
  0xf9   : > { %1858 = vrot.lane.b32.xlu1 %v2035_v7, %s2042_s5 }
  0xfc   : > { %1863 = vrot.lane.b32.xlu0 %v2035_v7, %s2043_s6 }
  0xfd   : > { %816 = vrot.lane.b32.xlu1 %v411_v56, %s2042_s5 }
 0x100   : > { %899 = vrot.lane.b32.xlu0 %v411_v56, %s2043_s6  ;;  %v507_v56 = vstv %s2285_s23  ;;  %s2332_s23 = sld [smem:[#allocation5 + $0x2c]] }
 0x101   : > { %891 = vrot.lane.b32.xlu1 %v409_v57, %s2043_s6 }
 0x105   : > { %895 = vrot.lane.b32.xlu1 %v410_v58, %s2043_s6  ;;  %v456_v58 = vadd.f32 %v454_v53, %v449_v49 }
 0x107   : > { %v463_v14 = vadd.f32 %v461_v1, %v456_v58 }
 0x109   : > { %901 = vrot.lane.b32.xlu1 %v2035_v7, %s2043_s6 }
 0x10d   : > { %1868 = vrot.lane.b32.xlu1 %v2035_v7, %s2038_s19 }
 0x13a   : > { %v485_v25 = vpop.permute.xlu0 %484 }
 0x13b   : > { %v477_v27 = vpop.permute.xlu1 %476 }
 0x13c   : > { %v489_v31 = vsel %vm488_vm5, %v477_v27, %v1840_v19 }
 0x13d   : > { %495 = vst [vmem:[#allocation4] sm:$0xff] %v489_v31  ;;  %v501_v55 = vmul.f32 %v500_v47, %v489_v31  ;;  %v535_v31 = vstv %s2297_s7  ;;  %s2369_s7 = sld [smem:[#allocation5 + $0x18]] }
 0x13e   : > { %v560_v37 = vpop.permute.xlu0 %559 }
 0x13f   : > { %v481_v40 = vpop.permute.xlu1 %480  ;;  %v503_v3 = vadd.f32 %v501_v55, %v462_v59 }
 0x140   : > { %v490_v41 = vsel %vm488_vm5, %v481_v40, %v1841_v35 }
 0x141   : > { %496 = vst [vmem:[#allocation4 + $0x8] sm:$0xff] %v490_v41  ;;  %v502_v2 = vmul.f32 %v500_v47, %v490_v41 }
 0x142   : > { %v564_v48 = vpop.permute.xlu0 %563 }
 0x143   : > { %v487_v51 = vpop.permute.xlu1 %486  ;;  %v504_v23 = vadd.f32 %v502_v2, %v463_v14 }
 0x144   : > { %v491_v52 = vsel %vm488_vm5, %v485_v25, %v487_v51  ;;  %v590_v51 = vstv %s2309_s27  ;;  %s2404_s27 = sld [smem:[#allocation5 + $0x2d]] }
 0x145   : > { %497 = vst [vmem:[#allocation4 + $0x10] sm:$0xff] %v491_v52  ;;  %v597_v52 = vstv %s2313_s28  ;;  %s2409_s28 = sld [smem:[#allocation5 + $0x4]] }
 0x146   : > { %v570_v57 = vpop.permute.xlu0 %569 }
 0x147   : > { %v1844_v60 = vpop.permute.xlu1 %1843 }
 0x148   : > { %v1845_v62 = vunpack.i.l.bf16 %v1844_v60  ;;  %v505_v63 = vld [vmem:[#allocation4 + $0x1] sm:$0xff]  ;;  %v1846_v4 = vunpack.i.h.bf16 %v1844_v60 }
 0x149   : > { %v512_v0 = vld [vmem:[#allocation4 + $0x2] sm:$0xff]  ;;  %v508_v5 = vmul.f32 %v507_v56, %v505_v63 }
 0x14a   : > { %v519_v6 = vld [vmem:[#allocation4 + $0x3] sm:$0xff]  ;;  %v572_v12 = vsel %vm571_vm6, %v560_v37, %v1845_v62  ;;  %v2307_v13 = vpop.permute.xlu0 %1848  ;;  %v515_v16 = vmul.f32 %v514_v61, %v512_v0  ;;  %v2316_v30 = vsel %vm571_vm6, %v564_v48, %v1846_v4 }
 0x14b   : > { %v526_v9 = vld [vmem:[#allocation4 + $0x4] sm:$0xff]  ;;  %v510_v15 = vadd.f32 %v508_v5, %v503_v3  ;;  %v568_v17 = vpop.permute.xlu1 %567  ;;  %v522_v29 = vmul.f32 %v521_v8, %v519_v6  ;;  %v1850_v44 = vunpack.i.l.bf16 %v2307_v13  ;;  %v584_v54 = vmul.f32 %v583_v43, %v572_v12 }
 0x14c   : > { %v533_v10 = vld [vmem:[#allocation4 + $0x5] sm:$0xff]  ;;  %v574_v22 = vsel %vm571_vm6, %v568_v17, %v570_v57  ;;  %v534_v25 = vld [vmem:[#allocation4 + $0xd] sm:$0xff]  ;;  %v529_v35 = vmul.f32 %v528_v21, %v526_v9  ;;  %v1851_v63 = vunpack.i.h.bf16 %v2307_v13 }
 0x14d   : > { %v540_v11 = vld [vmem:[#allocation4 + $0x6] sm:$0xff]  ;;  %v541_v26 = vld [vmem:[#allocation4 + $0xe] sm:$0xff]  ;;  %v517_v28 = vadd.f32 %v515_v16, %v510_v15  ;;  %v536_v41 = vmul.f32 %v535_v31, %v533_v10  ;;  %v537_v59 = vmul.f32 %v535_v31, %v534_v25  ;;  %v604_v10 = vstv %s2320_s29  ;;  %s2418_s29 = sld [smem:[#allocation5 + $0xb]] }
 0x14e   : > { %578 = vst [vmem:[#allocation4] sm:$0xff] %v572_v12  ;;  %v506_v18 = vld [vmem:[#allocation4 + $0x9] sm:$0xff]  ;;  %v651_v32 = vpop.permute.xlu0 %650  ;;  %v543_v48 = vmul.f32 %v542_v38, %v540_v11  ;;  %v544_v11 = vmul.f32 %v542_v38, %v541_v26 }
 0x14f   : > { %v513_v19 = vld [vmem:[#allocation4 + $0xa] sm:$0xff]  ;;  %v509_v27 = vmul.f32 %v507_v56, %v506_v18  ;;  %v524_v34 = vadd.f32 %v522_v29, %v517_v28  ;;  %v643_v36 = vpop.permute.xlu1 %642 }
 0x150   : > { %v520_v20 = vld [vmem:[#allocation4 + $0xb] sm:$0xff]  ;;  %v516_v33 = vmul.f32 %v514_v61, %v513_v19  ;;  %v2338_v0 = vsel %vm654_vm7, %v643_v36, %v1850_v44  ;;  %v611_v19 = vstv %s2323_s26  ;;  %s2422_s26 = sld [smem:[#allocation5 + $0x12]] }
 0x151   : > { %v527_v24 = vld [vmem:[#allocation4 + $0xc] sm:$0xff]  ;;  %v511_v37 = vadd.f32 %v509_v27, %v504_v23  ;;  %v523_v39 = vmul.f32 %v521_v8, %v520_v20  ;;  %v531_v40 = vadd.f32 %v529_v35, %v524_v34  ;;  %v585_v20 = vmul.f32 %v583_v43, %v2316_v30 }
 0x152   : > { %579 = vst [vmem:[#allocation4 + $0x8] sm:$0xff] %v2316_v30  ;;  %580 = vst [vmem:[#allocation4 + $0x10] sm:$0xff] %v574_v22  ;;  %v299_v45 = vpop.permute.xlu0 %298  ;;  %v530_v46 = vmul.f32 %v528_v21, %v527_v24  ;;  %v618_v27 = vstv %s2328_s17  ;;  %s2436_s17 = sld [smem:[#allocation5 + $0x20]] }
 0x153   : > { %v518_v42 = vadd.f32 %v516_v33, %v511_v37  ;;  %v538_v47 = vadd.f32 %v536_v41, %v531_v40  ;;  %v653_v49 = vpop.permute.xlu1 %652  ;;  %308 = vst.msk [vmem:[#allocation3 + $0x30] sm:$0xf8] %vm285_vm3, %v299_v45  ;;  %v625_v33 = vstv %s2332_s23  ;;  %v666_v40 = vstv %s2341_s30  ;;  %s2452_s23 = sld [smem:[#allocation5 + $0x27]] }
 0x154   : > { %v657_v1 = vsel %vm654_vm7, %v651_v32, %v653_v49  ;;  %s2473_s30 = sld [smem:[#allocation5 + $0x5]] }
 0x155   : > { %v525_v50 = vadd.f32 %v523_v39, %v518_v42  ;;  %v545_v53 = vadd.f32 %v543_v48, %v538_v47 }
 0x156   : > { %v303_v2 = vpop.permute.xlu0 %302 }
 0x157   : > { %v532_v58 = vadd.f32 %v530_v46, %v525_v50  ;;  %v586_v3 = vadd.f32 %v584_v54, %v545_v53  ;;  %v647_v9 = vpop.permute.xlu1 %646  ;;  %310 = vst.msk [vmem:[#allocation3 + $0x50] sm:$0x7] %vm289_vm2, %v303_v2 }
 0x158   : > { %v2351_v15 = vsel %vm654_vm7, %v647_v9, %v1851_v63 }
 0x159   : > { %v588_v55 = vld [vmem:[#allocation4 + $0x1] sm:$0xff]  ;;  %v589_v5 = vld [vmem:[#allocation4 + $0x9] sm:$0xff]  ;;  %v539_v16 = vadd.f32 %v537_v59, %v532_v58  ;;  %v667_v59 = vmul.f32 %v666_v40, %v2338_v0 }
 0x15a   : > { %v595_v56 = vld [vmem:[#allocation4 + $0x2] sm:$0xff]  ;;  %v591_v4 = vmul.f32 %v590_v51, %v588_v55  ;;  %v596_v6 = vld [vmem:[#allocation4 + $0xa] sm:$0xff]  ;;  %v1854_v22 = vpop.permute.xlu0 %1853  ;;  %v592_v30 = vmul.f32 %v590_v51, %v589_v5 }
 0x15b   : > { %v602_v57 = vld [vmem:[#allocation4 + $0x3] sm:$0xff]  ;;  %v603_v8 = vld [vmem:[#allocation4 + $0xb] sm:$0xff]  ;;  %v598_v18 = vmul.f32 %v597_v52, %v595_v56  ;;  %v546_v23 = vadd.f32 %v544_v11, %v539_v16  ;;  %v301_v26 = vpop.permute.xlu1 %300  ;;  %v1855_v28 = vunpack.i.l.bf16 %v1854_v22  ;;  %v599_v37 = vmul.f32 %v597_v52, %v596_v6 }
 0x15c   : > { %v609_v60 = vld [vmem:[#allocation4 + $0x4] sm:$0xff]  ;;  %v610_v12 = vld [vmem:[#allocation4 + $0xc] sm:$0xff]  ;;  %v593_v17 = vadd.f32 %v591_v4, %v586_v3  ;;  %v605_v25 = vmul.f32 %v604_v10, %v602_v57  ;;  %309 = vst.msk [vmem:[#allocation3 + $0x40] sm:$0xff] %vm287_vm4, %v301_v26  ;;  %v1856_v42 = vunpack.i.h.bf16 %v1854_v22  ;;  %v606_v48 = vmul.f32 %v604_v10, %v603_v8 }
 0x15d   : > { %v616_v61 = vld [vmem:[#allocation4 + $0x5] sm:$0xff]  ;;  %v2346_v13 = vld [vmem:[#allocation4 + $0xd] sm:$0xff]  ;;  %v587_v29 = vadd.f32 %v585_v20, %v546_v23  ;;  %v612_v32 = vmul.f32 %v611_v19, %v609_v60  ;;  %v613_v56 = vmul.f32 %v611_v19, %v610_v12  ;;  %v673_v57 = vstv %s2358_s3  ;;  %s2479_s3 = sld [smem:[#allocation5 + $0xc]] }
 0x15e   : > { %v2334_v62 = vld [vmem:[#allocation4 + $0x6] sm:$0xff]  ;;  %v2348_v14 = vld [vmem:[#allocation4 + $0xe] sm:$0xff]  ;;  %v600_v24 = vadd.f32 %v598_v18, %v593_v17  ;;  %v734_v35 = vpop.permute.xlu0 %733  ;;  %v619_v39 = vmul.f32 %v618_v27, %v616_v61  ;;  %v620_v6 = vmul.f32 %v618_v27, %v2346_v13  ;;  %v680_v8 = vstv %s2364_s18  ;;  %s2487_s18 = sld [smem:[#allocation5 + $0x13]] }
 0x15f   : > { %661 = vst [vmem:[#allocation4] sm:$0xff] %v2338_v0  ;;  %663 = vst [vmem:[#allocation4 + $0x10] sm:$0xff] %v657_v1  ;;  %v2356_v21 = vld [vmem:[#allocation3 + $0x30] sm:$0xff]  ;;  %v594_v36 = vadd.f32 %v592_v30, %v587_v29  ;;  %v726_v41 = vpop.permute.xlu1 %725  ;;  %v626_v50 = vmul.f32 %v625_v33, %v2334_v62  ;;  %v627_v12 = vmul.f32 %v625_v33, %v2348_v14  ;;  %v687_v16 = vstv %s2369_s7  ;;  %s2495_s7 = sld [smem:[#allocation5 + $0x1a]] }
 0x160   : > { %662 = vst [vmem:[#allocation4 + $0x8] sm:$0xff] %v2351_v15  ;;  %1029 = vrot.lane.b32.xlu0 %v2356_v21, %s2038_s19  ;;  %v607_v31 = vadd.f32 %v605_v25, %v600_v24  ;;  %v2367_v34 = vld [vmem:[#allocation3 + $0x50] sm:$0xff]  ;;  %v2375_v46 = vsel %vm737_vm8, %v726_v41, %v1855_v28  ;;  %v668_v22 = vmul.f32 %v666_v40, %v2351_v15  ;;  %v694_v23 = vstv %s2377_s8  ;;  %s2516_s8 = sld [smem:[#allocation5 + $0x21]] }
 0x161   : > { %1037 = vrot.lane.b32.xlu1 %v2367_v34, %s2038_s19  ;;  %v601_v47 = vadd.f32 %v599_v37, %v594_v36  ;;  %v701_v28 = vstv %s2385_s16  ;;  %s2539_s16 = sld [smem:[#allocation5 + $0x2f]] }
 0x162   : > { %v614_v38 = vadd.f32 %v612_v32, %v607_v31  ;;  %v809_v62 = vpop.permute.xlu0 %808 }
 0x163   : > { %v608_v55 = vadd.f32 %v606_v48, %v601_v47  ;;  %v2389_v60 = vld [vmem:[#allocation3 + $0x40] sm:$0xff]  ;;  %v730_v61 = vpop.permute.xlu1 %729 }
 0x164   : > { %v621_v49 = vadd.f32 %v619_v39, %v614_v38  ;;  %v2394_v2 = vsel %vm737_vm8, %v730_v61, %v1856_v42  ;;  %1033 = vrot.lane.b32.xlu0 %v2389_v60, %s2038_s19 }
 0x165   : > { %1111 = vrot.lane.b32.xlu1 %v2356_v21, %s2039_s22  ;;  %v615_v5 = vadd.f32 %v613_v56, %v608_v55 }
 0x166   : > { %v628_v58 = vadd.f32 %v626_v50, %v621_v49  ;;  %v813_v14 = vpop.permute.xlu0 %812 }
 0x167   : > { %v671_v43 = vld [vmem:[#allocation4 + $0x1] sm:$0xff]  ;;  %v672_v54 = vld [vmem:[#allocation4 + $0x9] sm:$0xff]  ;;  %v622_v11 = vadd.f32 %v620_v6, %v615_v5  ;;  %v736_v17 = vpop.permute.xlu1 %735 }
 0x168   : > { %v678_v44 = vld [vmem:[#allocation4 + $0x2] sm:$0xff]  ;;  %v679_v63 = vld [vmem:[#allocation4 + $0xa] sm:$0xff]  ;;  %v669_v9 = vadd.f32 %v667_v59, %v628_v58  ;;  %v674_v10 = vmul.f32 %v673_v57, %v671_v43  ;;  %v740_v13 = vsel %vm737_vm8, %v734_v35, %v736_v17  ;;  %1039 = vrot.lane.b32.xlu0 %v2035_v7, %s2038_s19  ;;  %v675_v27 = vmul.f32 %v673_v57, %v672_v54  ;;  %s2429_s19 = sld [smem:[#allocation5 + $0x19]] }
 0x169   : > { %v685_v45 = vld [vmem:[#allocation4 + $0x3] sm:$0xff]  ;;  %v686_v1 = vld [vmem:[#allocation4 + $0xb] sm:$0xff]  ;;  %1115 = vrot.lane.b32.xlu1 %v2389_v60, %s2039_s22  ;;  %v681_v19 = vmul.f32 %v680_v8, %v678_v44  ;;  %v629_v20 = vadd.f32 %v627_v12, %v622_v11  ;;  %v682_v33 = vmul.f32 %v680_v8, %v679_v63  ;;  %v708_v35 = vstv %s2404_s27  ;;  %s2543_s27 = sld [smem:[#allocation5 + $0x6]] }
 0x16a   : > { %v692_v51 = vld [vmem:[#allocation4 + $0x4] sm:$0xff]  ;;  %v2398_v3 = vld [vmem:[#allocation4 + $0xc] sm:$0xff]  ;;  %v676_v18 = vadd.f32 %v674_v10, %v669_v9  ;;  %v688_v25 = vmul.f32 %v687_v16, %v685_v45  ;;  %v689_v44 = vmul.f32 %v687_v16, %v686_v1  ;;  %v749_v45 = vstv %s2409_s28  ;;  %v819_v50 = vpop.permute.xlu0 %818  ;;  %s2551_s28 = sld [smem:[#allocation5 + $0xd]] }
 0x16b   : > { %v2380_v52 = vld [vmem:[#allocation4 + $0x5] sm:$0xff]  ;;  %v2400_v4 = vld [vmem:[#allocation4 + $0xd] sm:$0xff]  ;;  %v670_v26 = vadd.f32 %v668_v22, %v629_v20  ;;  %v1859_v29 = vpop.permute.xlu1 %1858  ;;  %v695_v31 = vmul.f32 %v694_v23, %v692_v51  ;;  %v696_v61 = vmul.f32 %v694_v23, %v2398_v3  ;;  %v750_v8 = vmul.f32 %v749_v45, %v2375_v46 }
 0x16c   : > { %v2382_v53 = vld [vmem:[#allocation4 + $0x6] sm:$0xff]  ;;  %v2402_v0 = vld [vmem:[#allocation4 + $0xe] sm:$0xff]  ;;  %v683_v24 = vadd.f32 %v681_v19, %v676_v18  ;;  %v1860_v32 = vunpack.i.l.bf16 %v1859_v29  ;;  %1873 = vrot.lane.b32.xlu0 %v2035_v7, %s2039_s22  ;;  %v1861_v36 = vunpack.i.h.bf16 %v1859_v29  ;;  %v702_v38 = vmul.f32 %v701_v28, %v2380_v52 }
 0x16d   : > { %744 = vst [vmem:[#allocation4] sm:$0xff] %v2375_v46  ;;  %745 = vst [vmem:[#allocation4 + $0x8] sm:$0xff] %v2394_v2  ;;  %1121 = vrot.lane.b32.xlu1 %v2035_v7, %s2039_s22  ;;  %v677_v15 = vadd.f32 %v675_v27, %v670_v26  ;;  %v709_v54 = vmul.f32 %v708_v35, %v2382_v53  ;;  %v703_v3 = vmul.f32 %v701_v28, %v2400_v4 }
 0x16e   : > { %746 = vst [vmem:[#allocation4 + $0x10] sm:$0xff] %v740_v13  ;;  %v690_v30 = vadd.f32 %v688_v25, %v683_v24  ;;  %v2434_v42 = vsel %vm820_vm9, %v809_v62, %v1860_v32  ;;  %v756_v62 = vstv %s2418_s29  ;;  %v2463_v5 = vsel %vm820_vm9, %v813_v14, %v1861_v36  ;;  %v1864_v4 = vpop.permute.xlu0 %1863  ;;  %s2561_s29 = sld [smem:[#allocation5 + $0x14]] }
 0x16f   : > { %v684_v43 = vadd.f32 %v682_v33, %v677_v15  ;;  %v817_v51 = vpop.permute.xlu1 %816  ;;  %v763_v10 = vstv %s2422_s26  ;;  %v710_v17 = vmul.f32 %v708_v35, %v2402_v0  ;;  %v770_v18 = vstv %s2429_s19  ;;  %s2583_s26 = sld [smem:[#allocation5 + $0x22]] }
 0x170   : > { %v697_v37 = vadd.f32 %v695_v31, %v690_v30  ;;  %v823_v58 = vsel %vm820_vm9, %v817_v51, %v819_v50  ;;  %1119 = vrot.lane.b32.xlu0 %v2367_v34, %s2039_s22  ;;  %s2466_s22 = sld [smem:[#allocation5 + $0x2e]]  ;;  %v1866_v20 = vunpack.i.h.bf16 %v1864_v4  ;;  %v751_v23 = vmul.f32 %v749_v45, %v2394_v2 }
 0x171   : > { %1878 = vrot.lane.b32.xlu1 %v2035_v7, %s2040_s24  ;;  %v691_v59 = vadd.f32 %v689_v44, %v684_v43  ;;  %v777_v14 = vstv %s2436_s17  ;;  %v1865_v27 = vunpack.i.l.bf16 %v1864_v4  ;;  %v784_v29 = vstv %s2452_s23  ;;  %s2592_s19 = sld [smem:[#allocation5 + $0x29]] }
 0x172   : > { %v704_v52 = vadd.f32 %v702_v38, %v697_v37  ;;  %v853_v4 = vstv %s2495_s7  ;;  %s2597_s17 = sld [smem:[#allocation5 + $0x30]] }
 0x173   : > { %v698_v9 = vadd.f32 %v696_v61, %v691_v59  ;;  %v892_v11 = vpop.permute.xlu1 %891  ;;  %s2605_s23 = sld [smem:[#allocation5 + $0x31]] }
 0x174   : > { %v754_v39 = vld [vmem:[#allocation4 + $0x1] sm:$0xff]  ;;  %v711_v6 = vadd.f32 %v709_v54, %v704_v52  ;;  %1193 = vrot.lane.b32.xlu0 %v2356_v21, %s2040_s24  ;;  %v2511_v54 = vsel %vm903_vm10, %v892_v11, %v1865_v27  ;;  %s2638_s7 = sld [smem:[#allocation5 + $0x32]] }
 0x175   : > { %v761_v40 = vld [vmem:[#allocation4 + $0x2] sm:$0xff]  ;;  %v762_v56 = vld [vmem:[#allocation4 + $0xa] sm:$0xff]  ;;  %1201 = vrot.lane.b32.xlu1 %v2367_v34, %s2040_s24  ;;  %v757_v16 = vmul.f32 %v756_v62, %v754_v39  ;;  %v705_v46 = vadd.f32 %v703_v3, %v698_v9  ;;  %v839_v9 = vstv %s2479_s3  ;;  %s2632_s3 = sld [smem:[#allocation5 + $0x54]] }
 0x176   : > { %v768_v41 = vld [vmem:[#allocation4 + $0x3] sm:$0xff]  ;;  %v2447_v57 = vld [vmem:[#allocation4 + $0xb] sm:$0xff]  ;;  %v752_v12 = vadd.f32 %v750_v8, %v711_v6  ;;  %v764_v13 = vmul.f32 %v763_v10, %v761_v40  ;;  %v765_v36 = vmul.f32 %v763_v10, %v762_v56  ;;  %v791_v37 = vstv %s2466_s22  ;;  %s2628_s22 = sld [smem:[#allocation5 + $0x46]] }
 0x177   : > { %v775_v47 = vld [vmem:[#allocation4 + $0x4] sm:$0xff]  ;;  %v2456_v63 = vld [vmem:[#allocation4 + $0xc] sm:$0xff]  ;;  %v712_v22 = vadd.f32 %v710_v17, %v705_v46  ;;  %v896_v24 = vpop.permute.xlu1 %895  ;;  %v771_v26 = vmul.f32 %v770_v18, %v768_v41  ;;  %v900_v41 = vpop.permute.xlu0 %899 }
 0x178   : > { %v2439_v48 = vld [vmem:[#allocation4 + $0x5] sm:$0xff]  ;;  %v2458_v53 = vld [vmem:[#allocation4 + $0xd] sm:$0xff]  ;;  %v759_v19 = vadd.f32 %v757_v16, %v752_v12  ;;  %1197 = vrot.lane.b32.xlu0 %v2389_v60, %s2040_s24  ;;  %v778_v2 = vmul.f32 %v777_v14, %v775_v47  ;;  %v2493_v33 = vsel %vm903_vm10, %v896_v24, %v1866_v20  ;;  %v832_v47 = vstv %s2473_s30  ;;  %s2630_s30 = sld [smem:[#allocation5 + $0x4d]] }
 0x179   : > { %v2441_v49 = vld [vmem:[#allocation4 + $0x6] sm:$0xff]  ;;  %v2460_v1 = vld [vmem:[#allocation4 + $0xe] sm:$0xff]  ;;  %1275 = vrot.lane.b32.xlu1 %v2356_v21, %s2041_s4  ;;  %v753_v0 = vadd.f32 %v751_v23, %v712_v22  ;;  %v785_v45 = vmul.f32 %v784_v29, %v2439_v48  ;;  %v772_v48 = vmul.f32 %v770_v18, %v2447_v57  ;;  %v779_v57 = vmul.f32 %v777_v14, %v2456_v63 }
 0x17a   : > { %827 = vst [vmem:[#allocation4] sm:$0xff] %v2434_v42  ;;  %v755_v55 = vld [vmem:[#allocation4 + $0x9] sm:$0xff]  ;;  %v766_v25 = vadd.f32 %v764_v13, %v759_v19  ;;  %v792_v6 = vmul.f32 %v791_v37, %v2441_v49  ;;  %v833_v49 = vmul.f32 %v832_v47, %v2434_v42  ;;  %v786_v12 = vmul.f32 %v784_v29, %v2458_v53 }
 0x17b   : > { %829 = vst [vmem:[#allocation4 + $0x10] sm:$0xff] %v823_v58  ;;  %828 = vst [vmem:[#allocation4 + $0x8] sm:$0xff] %v2463_v5  ;;  %v758_v28 = vmul.f32 %v756_v62, %v755_v55  ;;  %v902_v43 = vpop.permute.xlu1 %901  ;;  %v2532_v3 = vld [vmem:[#allocation3 + $0x8] sm:$0xff]  ;;  %v846_v63 = vstv %s2487_s18  ;;  %v793_v18 = vmul.f32 %v791_v37, %v2460_v1  ;;  %v834_v13 = vmul.f32 %v832_v47, %v2463_v5  ;;  %s2636_s18 = sld [smem:[#allocation5 + $0x5b]] }
 0x17c   : > { %v773_v30 = vadd.f32 %v771_v26, %v766_v25  ;;  %v906_v55 = vsel %vm903_vm10, %v900_v41, %v902_v43  ;;  %1203 = vrot.lane.b32.xlu0 %v2035_v7, %s2040_s24  ;;  %s2528_s24 = sld [smem:[#allocation5 + $0x28]]  ;;  %v860_v20 = vstv %s2516_s8  ;;  %v874_v41 = vstv %s2539_s16 }
 0x17d   : > { %v760_v35 = vadd.f32 %v758_v28, %v753_v0  ;;  %1279 = vrot.lane.b32.xlu1 %v2389_v60, %s2041_s4  ;;  %s2641_s8 = sld [smem:[#allocation5 + $0x39]] }
 0x17e   : > { %v780_v44 = vadd.f32 %v778_v2, %v773_v30  ;;  %s2647_s16 = sld [smem:[#allocation5 + $0x47]] }
 0x17f   : > { %v767_v56 = vadd.f32 %v765_v36, %v760_v35 }
 0x180   : > { %v787_v62 = vadd.f32 %v785_v45, %v780_v44  ;;  %1883 = vrot.lane.b32.xlu0 %v2035_v7, %s2041_s4 }
 0x181   : > { %v774_v8 = vadd.f32 %v772_v48, %v767_v56  ;;  %1285 = vrot.lane.b32.xlu1 %v2532_v3, %s2041_s4  ;;  %v922_v48 = vstv %s2551_s28  ;;  %s2654_s28 = sld [smem:[#allocation5 + $0x55]] }
 0x182   : > { %v837_v31 = vld [vmem:[#allocation4 + $0x1] sm:$0xff]  ;;  %v2490_v32 = vld [vmem:[#allocation4 + $0x9] sm:$0xff]  ;;  %v794_v10 = vadd.f32 %v792_v6, %v787_v62  ;;  %v867_v29 = vstv %s2528_s24  ;;  %s2645_s24 = sld [smem:[#allocation5 + $0x40]] }
 0x183   : > { %v844_v15 = vld [vmem:[#allocation4 + $0x2] sm:$0xff]  ;;  %v2498_v38 = vld [vmem:[#allocation4 + $0xa] sm:$0xff]  ;;  %v781_v11 = vadd.f32 %v779_v57, %v774_v8  ;;  %v840_v46 = vmul.f32 %v839_v9, %v837_v31  ;;  %v841_v28 = vmul.f32 %v839_v9, %v2490_v32 }
 0x184   : > { %v851_v39 = vld [vmem:[#allocation4 + $0x3] sm:$0xff]  ;;  %v2500_v40 = vld [vmem:[#allocation4 + $0xb] sm:$0xff]  ;;  %v835_v16 = vadd.f32 %v833_v49, %v794_v10  ;;  %v847_v19 = vmul.f32 %v846_v63, %v844_v15  ;;  %1283 = vrot.lane.b32.xlu0 %v2367_v34, %s2041_s4  ;;  %s2575_s4 = sld [smem:[#allocation5 + $0x1b]] }
 0x185   : > { %v858_v50 = vld [vmem:[#allocation4 + $0x4] sm:$0xff]  ;;  %v2506_v51 = vld [vmem:[#allocation4 + $0xc] sm:$0xff]  ;;  %v788_v17 = vadd.f32 %v786_v12, %v781_v11  ;;  %1888 = vrot.lane.b32.xlu1 %v2035_v7, %s2042_s5  ;;  %v854_v24 = vmul.f32 %v853_v4, %v851_v39  ;;  %v848_v39 = vmul.f32 %v846_v63, %v2498_v38  ;;  %v855_v47 = vmul.f32 %v853_v4, %v2500_v40 }
 0x186   : > { %v2508_v52 = vld [vmem:[#allocation4 + $0x5] sm:$0xff]  ;;  %v2519_v58 = vld [vmem:[#allocation4 + $0xd] sm:$0xff]  ;;  %v842_v42 = vadd.f32 %v840_v46, %v835_v16  ;;  %v861_v15 = vmul.f32 %v860_v20, %v858_v50  ;;  %v915_v50 = vstv %s2543_s27  ;;  %v943_v63 = vstv %s2583_s26  ;;  %s2652_s27 = sld [smem:[#allocation5 + $0x4e]] }
 0x187   : > { %v2521_v59 = vld [vmem:[#allocation4 + $0x6] sm:$0xff]  ;;  %v2523_v61 = vld [vmem:[#allocation4 + $0xe] sm:$0xff]  ;;  %v795_v53 = vadd.f32 %v793_v18, %v788_v17  ;;  %v868_v44 = vmul.f32 %v867_v29, %v2508_v52  ;;  %v862_v52 = vmul.f32 %v860_v20, %v2506_v51  ;;  %v916_v40 = vmul.f32 %v915_v50, %v2511_v54  ;;  %s2667_s26 = sld [smem:[#allocation5 + $0x3a]] }
 0x188   : > { %910 = vst [vmem:[#allocation4] sm:$0xff] %v2511_v54  ;;  %911 = vst [vmem:[#allocation4 + $0x8] sm:$0xff] %v2493_v33  ;;  %v849_v14 = vadd.f32 %v847_v19, %v842_v42  ;;  %1357 = vrot.lane.b32.xlu0 %v2356_v21, %s2042_s5  ;;  %v869_v8 = vmul.f32 %v867_v29, %v2519_v58  ;;  %v876_v54 = vmul.f32 %v874_v41, %v2523_v61 }
 0x189   : > { %912 = vst [vmem:[#allocation4 + $0x10] sm:$0xff] %v906_v55  ;;  %v836_v0 = vadd.f32 %v834_v13, %v795_v53  ;;  %1365 = vrot.lane.b32.xlu1 %v2367_v34, %s2042_s5  ;;  %v875_v55 = vmul.f32 %v874_v41, %v2521_v59  ;;  %v929_v59 = vstv %s2561_s29  ;;  %v917_v12 = vmul.f32 %v915_v50, %v2493_v33  ;;  %s2657_s29 = sld [smem:[#allocation5 + $0x5c]] }
 0x18a   : > { %v856_v31 = vadd.f32 %v854_v24, %v849_v14  ;;  %v936_v10 = vstv %s2575_s4  ;;  %v950_v18 = vstv %s2592_s19  ;;  %v957_v33 = vstv %s2597_s17  ;;  %s2663_s4 = sld [smem:[#allocation5 + $0x33]] }
 0x18b   : > { %v843_v32 = vadd.f32 %v841_v28, %v836_v0  ;;  %s2673_s19 = sld [smem:[#allocation5 + $0x41]] }
 0x18c   : > { %v863_v43 = vadd.f32 %v861_v15, %v856_v31  ;;  %1361 = vrot.lane.b32.xlu0 %v2389_v60, %s2042_s5  ;;  %s2677_s17 = sld [smem:[#allocation5 + $0x48]] }
 0x18d   : > { %v850_v45 = vadd.f32 %v848_v39, %v843_v32  ;;  %1439 = vrot.lane.b32.xlu1 %v2356_v21, %s2043_s6 }
 0x18e   : > { %v870_v38 = vadd.f32 %v868_v44, %v863_v43 }
 0x18f   : > { %v920_v22 = vld [vmem:[#allocation4 + $0x1] sm:$0xff]  ;;  %v857_v56 = vadd.f32 %v855_v47, %v850_v45 }
 0x190   : > { %v2555_v23 = vld [vmem:[#allocation4 + $0x9] sm:$0xff]  ;;  %v877_v62 = vadd.f32 %v875_v55, %v870_v38  ;;  %v923_v9 = vmul.f32 %v922_v48, %v920_v22  ;;  %1367 = vrot.lane.b32.xlu0 %v2532_v3, %s2042_s5  ;;  %s1700_s5 = sld [smem:[#allocation5 + $0x38]]  ;;  %v991_v38 = vstv %s2628_s22 }
 0x191   : > { %v927_v1 = vld [vmem:[#allocation4 + $0x2] sm:$0xff]  ;;  %v2557_v25 = vld [vmem:[#allocation4 + $0xa] sm:$0xff]  ;;  %v864_v6 = vadd.f32 %v862_v52, %v857_v56  ;;  %1443 = vrot.lane.b32.xlu1 %v2389_v60, %s2043_s6  ;;  %v924_v61 = vmul.f32 %v922_v48, %v2555_v23  ;;  %s2697_s22 = sld [smem:[#allocation5 + $0x34]] }
 0x192   : > { %v934_v26 = vld [vmem:[#allocation4 + $0x3] sm:$0xff]  ;;  %v2559_v27 = vld [vmem:[#allocation4 + $0xb] sm:$0xff]  ;;  %v918_v57 = vadd.f32 %v916_v40, %v877_v62  ;;  %v930_v11 = vmul.f32 %v929_v59, %v927_v1  ;;  %v931_v53 = vmul.f32 %v929_v59, %v2557_v25  ;;  %v970_v1 = vstv %s2605_s23  ;;  %s2683_s23 = sld [smem:[#allocation5 + $0x4f]] }
 0x193   : > { %v941_v5 = vld [vmem:[#allocation4 + $0x4] sm:$0xff]  ;;  %v2565_v30 = vld [vmem:[#allocation4 + $0xc] sm:$0xff]  ;;  %v871_v51 = vadd.f32 %v869_v8, %v864_v6  ;;  %v937_v46 = vmul.f32 %v936_v10, %v934_v26  ;;  %v938_v22 = vmul.f32 %v936_v10, %v2559_v27  ;;  %v971_v0 = vmul.f32 %v970_v1, %v2356_v21 }
 0x194   : > { %v948_v2 = vld [vmem:[#allocation4 + $0x5] sm:$0xff]  ;;  %v2569_v35 = vld [vmem:[#allocation4 + $0xd] sm:$0xff]  ;;  %v925_v49 = vadd.f32 %v923_v9, %v918_v57  ;;  %1893 = vrot.lane.b32.xlu0 %v2035_v7, %s2043_s6  ;;  %v944_v42 = vmul.f32 %v943_v63, %v941_v5  ;;  %v945_v23 = vmul.f32 %v943_v63, %v2565_v30  ;;  %v972_v31 = vmul.f32 %v970_v1, %v2389_v60 }
 0x195   : > { %v955_v36 = vld [vmem:[#allocation4 + $0x6] sm:$0xff]  ;;  %v2571_v37 = vld [vmem:[#allocation4 + $0xe] sm:$0xff]  ;;  %v878_v58 = vadd.f32 %v876_v54, %v871_v51  ;;  %1449 = vrot.lane.b32.xlu1 %v2532_v3, %s2043_s6  ;;  %v951_v20 = vmul.f32 %v950_v18, %v948_v2  ;;  %v952_v25 = vmul.f32 %v950_v18, %v2569_v35  ;;  %v998_v9 = vstv %s2630_s30  ;;  %s2707_s30 = sld [smem:[#allocation5 + $0x3b]] }
 0x196   : > { %965 = vst [vmem:[#allocation4] sm:$0xff] %v2356_v21  ;;  %966 = vst [vmem:[#allocation4 + $0x8] sm:$0xff] %v2389_v60  ;;  %v932_v16 = vadd.f32 %v930_v11, %v925_v49  ;;  %v958_v14 = vmul.f32 %v957_v33, %v955_v36  ;;  %v959_v2 = vmul.f32 %v957_v33, %v2571_v37  ;;  %v977_v30 = vstv %s1700_s5  ;;  %v1869_v36 = vpop.permute.xlu1 %1868  ;;  %s2686_s5 = sld [smem:[#allocation5 + $0x56]] }
 0x197   : > { %967 = vst [vmem:[#allocation4 + $0x10] sm:$0xff] %v2367_v34  ;;  %v919_v17 = vadd.f32 %v917_v12, %v878_v58  ;;  %v1870_v41 = vunpack.i.l.bf16 %v1869_v36  ;;  %v1871_v54 = vunpack.i.h.bf16 %v1869_v36  ;;  %v1005_v63 = vstv %s2632_s3  ;;  %s2710_s3 = sld [smem:[#allocation5 + $0x42]] }
 0x198   : > { %v939_v4 = vadd.f32 %v937_v46, %v932_v16  ;;  %1447 = vrot.lane.b32.xlu0 %v2367_v34, %s2043_s6  ;;  %s1707_s6 = sld [smem:[#allocation5 + $0x3f]]  ;;  %v1012_v33 = vstv %s2636_s18 }
 0x199   : > { %v926_v19 = vadd.f32 %v924_v61, %v919_v17  ;;  %s2716_s18 = sld [smem:[#allocation5 + $0x49]] }
 0x19a   : > { %v946_v13 = vadd.f32 %v944_v42, %v939_v4 }
 0x19b   : > { %v933_v3 = vadd.f32 %v931_v53, %v926_v19 }
 0x19c   : > { %v953_v7 = vadd.f32 %v951_v20, %v946_v13  ;;  %v1052_v13 = vstv %s2638_s7  ;;  %s2719_s7 = sld [smem:[#allocation5 + $0x50]] }
 0x19d   : > { %v940_v24 = vadd.f32 %v938_v22, %v933_v3  ;;  %v975_v15 = vld [vmem:[#allocation4 + $0x1] sm:$0xff] }
 0x19e   : > { %v960_v26 = vadd.f32 %v958_v14, %v953_v7  ;;  %v976_v21 = vld [vmem:[#allocation4 + $0x9] sm:$0xff]  ;;  %v978_v32 = vmul.f32 %v977_v30, %v975_v15  ;;  %v984_v39 = vstv %s1707_s6  ;;  %s2689_s6 = sld [smem:[#allocation5 + $0x5d]] }
 0x19f   : > { %v947_v28 = vadd.f32 %v945_v23, %v940_v24  ;;  %v982_v35 = vld [vmem:[#allocation4 + $0x2] sm:$0xff]  ;;  %v979_v43 = vmul.f32 %v977_v30, %v976_v21  ;;  %v983_v44 = vld [vmem:[#allocation4 + $0xa] sm:$0xff] }
 0x1a0   : > { %v973_v29 = vadd.f32 %v971_v0, %v960_v26  ;;  %v985_v60 = vmul.f32 %v984_v39, %v982_v35  ;;  %v989_v50 = vld [vmem:[#allocation4 + $0x3] sm:$0xff]  ;;  %v986_v40 = vmul.f32 %v984_v39, %v983_v44  ;;  %v990_v6 = vld [vmem:[#allocation4 + $0xb] sm:$0xff]  ;;  %v1059_v26 = vstv %s2641_s8  ;;  %s2726_s8 = sld [smem:[#allocation5 + $0x57]] }
 0x1a1   : > { %v954_v5 = vadd.f32 %v952_v25, %v947_v28  ;;  %v996_v52 = vld [vmem:[#allocation4 + $0x4] sm:$0xff]  ;;  %v992_v8 = vmul.f32 %v991_v38, %v989_v50  ;;  %v993_v10 = vmul.f32 %v991_v38, %v990_v6  ;;  %v997_v49 = vld [vmem:[#allocation4 + $0xc] sm:$0xff]  ;;  %v1073_v39 = vstv %s2647_s16  ;;  %s2745_s16 = sld [smem:[#allocation5 + $0x35]] }
 0x1a2   : > { %v980_v37 = vadd.f32 %v978_v32, %v973_v29  ;;  %v1003_v48 = vld [vmem:[#allocation4 + $0x5] sm:$0xff]  ;;  %v999_v11 = vmul.f32 %v998_v9, %v996_v52  ;;  %v1000_v61 = vmul.f32 %v998_v9, %v997_v49  ;;  %v1004_v18 = vld [vmem:[#allocation4 + $0xd] sm:$0xff]  ;;  %v1080_v52 = vstv %s2652_s27  ;;  %s2750_s27 = sld [smem:[#allocation5 + $0x3c]] }
 0x1a3   : > { %v961_v34 = vadd.f32 %v959_v2, %v954_v5  ;;  %v1010_v62 = vld [vmem:[#allocation4 + $0x6] sm:$0xff]  ;;  %v1011_v4 = vld [vmem:[#allocation4 + $0xe] sm:$0xff]  ;;  %v1006_v42 = vmul.f32 %v1005_v63, %v1003_v48  ;;  %v1007_v1 = vmul.f32 %v1005_v63, %v1004_v18 }
 0x1a4   : > { %v987_v56 = vadd.f32 %v985_v60, %v980_v37  ;;  %v1013_v7 = vmul.f32 %v1012_v33, %v1010_v62  ;;  %v1014_v29 = vmul.f32 %v1012_v33, %v1011_v4  ;;  %v1134_v4 = vstv %s2663_s4  ;;  %s2777_s4 = sld [smem:[#allocation5 + $0x51]] }
 0x1a5   : > { %v974_v27 = vadd.f32 %v972_v31, %v961_v34  ;;  %v1066_v31 = vstv %s2645_s24  ;;  %s2739_s24 = sld [smem:[#allocation5 + $0x5e]] }
 0x1a6   : > { %v994_v51 = vadd.f32 %v992_v8, %v987_v56 }
 0x1a7   : > { %v981_v47 = vadd.f32 %v979_v43, %v974_v27 }
 0x1a8   : > { %v1001_v46 = vadd.f32 %v999_v11, %v994_v51  ;;  %v1087_v51 = vstv %s2654_s28  ;;  %s2753_s28 = sld [smem:[#allocation5 + $0x43]] }
 0x1a9   : > { %v988_v57 = vadd.f32 %v986_v40, %v981_v47 }
 0x1aa   : > { %v1008_v3 = vadd.f32 %v1006_v42, %v1001_v46 }
 0x1ab   : > { %v995_v12 = vadd.f32 %v993_v10, %v988_v57 }
 0x1ac   : > { %v1015_v28 = vadd.f32 %v1013_v7, %v1008_v3  ;;  %v1141_v3 = vstv %s2667_s26  ;;  %s2789_s26 = sld [smem:[#allocation5 + $0x58]] }
 0x1ad   : > { %v1002_v53 = vadd.f32 %v1000_v61, %v995_v12  ;;  %v1094_v12 = vstv %s2657_s29  ;;  %s2758_s29 = sld [smem:[#allocation5 + $0x4a]] }
 0x1af   : > { %v1009_v23 = vadd.f32 %v1007_v1, %v1002_v53 }
 0x1b1   : > { %v1016_v35 = vadd.f32 %v1014_v29, %v1009_v23  ;;  %v1148_v29 = vstv %s2673_s19  ;;  %s2794_s19 = sld [smem:[#allocation5 + $0x5f]] }
 0x1d2   : > { %v1030_v45 = vpop.permute.xlu0 %1029 }
 0x1d3   : > { %v1041_v55 = vsel %vm488_vm5, %v1030_v45, %v1870_v41  ;;  %v1038_v59 = vpop.permute.xlu1 %1037 }
 0x1d4   : > { %1047 = vst [vmem:[#allocation4] sm:$0xff] %v1041_v55  ;;  %v1053_v14 = vmul.f32 %v1052_v13, %v1041_v55 }
 0x1d6   : > { %v1034_v16 = vpop.permute.xlu0 %1033  ;;  %v1055_v15 = vadd.f32 %v1053_v14, %v1015_v28 }
 0x1d7   : > { %v1112_v58 = vpop.permute.xlu1 %1111  ;;  %v1042_v17 = vsel %vm488_vm5, %v1034_v16, %v1871_v54 }
 0x1d8   : > { %1048 = vst [vmem:[#allocation4 + $0x8] sm:$0xff] %v1042_v17  ;;  %v1054_v5 = vmul.f32 %v1052_v13, %v1042_v17 }
 0x1da   : > { %v1040_v20 = vpop.permute.xlu0 %1039  ;;  %v1056_v50 = vadd.f32 %v1054_v5, %v1016_v35 }
 0x1db   : > { %v1116_v19 = vpop.permute.xlu1 %1115  ;;  %v1043_v22 = vsel %vm488_vm5, %v1038_v59, %v1040_v20 }
 0x1dc   : > { %1049 = vst [vmem:[#allocation4 + $0x10] sm:$0xff] %v1043_v22 }
 0x1de   : > { %v1874_v0 = vpop.permute.xlu0 %1873 }
 0x1df   : > { %v1122_v24 = vpop.permute.xlu1 %1121  ;;  %v1875_v25 = vunpack.i.l.bf16 %v1874_v0  ;;  %v1057_v2 = vld [vmem:[#allocation4 + $0x1] sm:$0xff]  ;;  %v1876_v27 = vunpack.i.h.bf16 %v1874_v0 }
 0x1e0   : > { %v1064_v34 = vld [vmem:[#allocation4 + $0x2] sm:$0xff]  ;;  %v1060_v30 = vmul.f32 %v1059_v26, %v1057_v2 }
 0x1e1   : > { %v1071_v36 = vld [vmem:[#allocation4 + $0x3] sm:$0xff]  ;;  %v1123_v21 = vsel %vm571_vm6, %v1112_v58, %v1875_v25  ;;  %v1067_v45 = vmul.f32 %v1066_v31, %v1064_v34  ;;  %v2671_v48 = vsel %vm571_vm6, %v1116_v19, %v1876_v27 }
 0x1e2   : > { %v1078_v41 = vld [vmem:[#allocation4 + $0x4] sm:$0xff]  ;;  %v1120_v44 = vpop.permute.xlu0 %1119  ;;  %v1062_v60 = vadd.f32 %v1060_v30, %v1055_v15  ;;  %v1074_v6 = vmul.f32 %v1073_v39, %v1071_v36  ;;  %v1135_v14 = vmul.f32 %v1134_v4, %v1123_v21 }
 0x1e3   : > { %v2661_v32 = vpop.permute.xlu1 %1878  ;;  %v1085_v37 = vld [vmem:[#allocation4 + $0x5] sm:$0xff]  ;;  %v1125_v47 = vsel %vm571_vm6, %v1120_v44, %v1122_v24  ;;  %v1086_v59 = vld [vmem:[#allocation4 + $0xd] sm:$0xff]  ;;  %v1081_v58 = vmul.f32 %v1080_v52, %v1078_v41  ;;  %v1155_v41 = vstv %s2677_s17  ;;  %s2799_s17 = sld [smem:[#allocation5 + $0x36]] }
 0x1e4   : > { %v1092_v43 = vld [vmem:[#allocation4 + $0x6] sm:$0xff]  ;;  %v1069_v40 = vadd.f32 %v1067_v45, %v1062_v60  ;;  %v1093_v57 = vld [vmem:[#allocation4 + $0xe] sm:$0xff]  ;;  %v1088_v17 = vmul.f32 %v1087_v51, %v1085_v37  ;;  %v1881_v61 = vunpack.i.h.bf16 %v2661_v32  ;;  %v1880_v20 = vunpack.i.l.bf16 %v2661_v32 }
 0x1e5   : > { %1129 = vst [vmem:[#allocation4] sm:$0xff] %v1123_v21  ;;  %v1058_v38 = vld [vmem:[#allocation4 + $0x9] sm:$0xff]  ;;  %v1095_v13 = vmul.f32 %v1094_v12, %v1092_v43  ;;  %v1089_v1 = vmul.f32 %v1087_v51, %v1086_v59  ;;  %v1096_v27 = vmul.f32 %v1094_v12, %v1093_v57  ;;  %v1136_v45 = vmul.f32 %v1134_v4, %v2671_v48 }
 0x1e6   : > { %v1065_v55 = vld [vmem:[#allocation4 + $0xa] sm:$0xff]  ;;  %v1061_v62 = vmul.f32 %v1059_v26, %v1058_v38  ;;  %v1194_v54 = vpop.permute.xlu0 %1193  ;;  %v1076_v11 = vadd.f32 %v1074_v6, %v1069_v40  ;;  %v1176_v59 = vstv %s2689_s6  ;;  %s2823_s6 = sld [smem:[#allocation5 + $0x4b]] }
 0x1e7   : > { %v1072_v56 = vld [vmem:[#allocation4 + $0xb] sm:$0xff]  ;;  %v1202_v9 = vpop.permute.xlu1 %1201  ;;  %v1068_v49 = vmul.f32 %v1066_v31, %v1065_v55  ;;  %v1205_v35 = vsel %vm654_vm7, %v1194_v54, %v1880_v20  ;;  %v1162_v55 = vstv %s2683_s23  ;;  %s2802_s23 = sld [smem:[#allocation5 + $0x3d]] }
 0x1e8   : > { %v1079_v8 = vld [vmem:[#allocation4 + $0xc] sm:$0xff]  ;;  %v1063_v10 = vadd.f32 %v1061_v62, %v1056_v50  ;;  %v1075_v16 = vmul.f32 %v1073_v39, %v1072_v56  ;;  %v1083_v46 = vadd.f32 %v1081_v58, %v1076_v11  ;;  %v1216_v11 = vstv %s2697_s22  ;;  %s2830_s22 = sld [smem:[#allocation5 + $0x52]] }
 0x1e9   : > { %1130 = vst [vmem:[#allocation4 + $0x8] sm:$0xff] %v2671_v48  ;;  %1131 = vst [vmem:[#allocation4 + $0x10] sm:$0xff] %v1125_v47  ;;  %v1082_v53 = vmul.f32 %v1080_v52, %v1079_v8  ;;  %v1169_v8 = vstv %s2686_s5  ;;  %s2810_s5 = sld [smem:[#allocation5 + $0x44]] }
 0x1ea   : > { %v1070_v63 = vadd.f32 %v1068_v49, %v1063_v10  ;;  %v1198_v42 = vpop.permute.xlu0 %1197  ;;  %v1090_v33 = vadd.f32 %v1088_v17, %v1083_v46 }
 0x1eb   : > { %v2681_v18 = vpop.permute.xlu1 %1275  ;;  %v2693_v0 = vsel %vm654_vm7, %v1198_v42, %v1881_v61 }
 0x1ec   : > { %v1077_v19 = vadd.f32 %v1075_v16, %v1070_v63  ;;  %v1097_v7 = vadd.f32 %v1095_v13, %v1090_v33 }
 0x1ee   : > { %v1084_v22 = vadd.f32 %v1082_v53, %v1077_v19  ;;  %v1204_v34 = vpop.permute.xlu0 %1203  ;;  %v1137_v15 = vadd.f32 %v1135_v14, %v1097_v7  ;;  %v1217_v7 = vmul.f32 %v1216_v11, %v1205_v35  ;;  %v1223_v14 = vstv %s2707_s30  ;;  %s2835_s30 = sld [smem:[#allocation5 + $0x59]] }
 0x1ef   : > { %v2695_v28 = vpop.permute.xlu1 %1279  ;;  %v1207_v39 = vsel %vm654_vm7, %v1202_v9, %v1204_v34 }
 0x1f0   : > { %v1139_v24 = vld [vmem:[#allocation4 + $0x1] sm:$0xff]  ;;  %v1140_v23 = vld [vmem:[#allocation4 + $0x9] sm:$0xff]  ;;  %v1091_v31 = vadd.f32 %v1089_v1, %v1084_v22 }
 0x1f1   : > { %v1146_v26 = vld [vmem:[#allocation4 + $0x2] sm:$0xff]  ;;  %v1147_v25 = vld [vmem:[#allocation4 + $0xa] sm:$0xff]  ;;  %v1142_v30 = vmul.f32 %v1141_v3, %v1139_v24  ;;  %v1143_v62 = vmul.f32 %v1141_v3, %v1140_v23 }
 0x1f2   : > { %v1153_v5 = vld [vmem:[#allocation4 + $0x3] sm:$0xff]  ;;  %v1154_v2 = vld [vmem:[#allocation4 + $0xb] sm:$0xff]  ;;  %v1098_v60 = vadd.f32 %v1096_v27, %v1091_v31  ;;  %v1149_v50 = vmul.f32 %v1148_v29, %v1146_v26  ;;  %v1884_v56 = vpop.permute.xlu0 %1883  ;;  %v1150_v48 = vmul.f32 %v1148_v29, %v1147_v25 }
 0x1f3   : > { %v1160_v36 = vld [vmem:[#allocation4 + $0x4] sm:$0xff]  ;;  %v1161_v21 = vld [vmem:[#allocation4 + $0xc] sm:$0xff]  ;;  %v1144_v47 = vadd.f32 %v1142_v30, %v1137_v15  ;;  %v1286_v38 = vpop.permute.xlu1 %1285  ;;  %v1156_v6 = vmul.f32 %v1155_v41, %v1153_v5  ;;  %v1885_v57 = vunpack.i.l.bf16 %v1884_v56  ;;  %v1157_v49 = vmul.f32 %v1155_v41, %v1154_v2 }
 0x1f4   : > { %v1167_v32 = vld [vmem:[#allocation4 + $0x5] sm:$0xff]  ;;  %v1168_v37 = vld [vmem:[#allocation4 + $0xd] sm:$0xff]  ;;  %v1138_v52 = vadd.f32 %v1136_v45, %v1098_v60  ;;  %v1163_v54 = vmul.f32 %v1162_v55, %v1160_v36  ;;  %v1886_v58 = vunpack.i.h.bf16 %v1884_v56  ;;  %v1164_v17 = vmul.f32 %v1162_v55, %v1161_v21 }
 0x1f5   : > { %v1174_v43 = vld [vmem:[#allocation4 + $0x6] sm:$0xff]  ;;  %v2703_v44 = vld [vmem:[#allocation4 + $0xe] sm:$0xff]  ;;  %v1151_v40 = vadd.f32 %v1149_v50, %v1144_v47  ;;  %v1170_v46 = vmul.f32 %v1169_v8, %v1167_v32  ;;  %v2723_v19 = vsel %vm737_vm8, %v2681_v18, %v1885_v57  ;;  %v1171_v5 = vmul.f32 %v1169_v8, %v1168_v37 }
 0x1f6   : > { %1211 = vst [vmem:[#allocation4] sm:$0xff] %v1205_v35  ;;  %1212 = vst [vmem:[#allocation4 + $0x8] sm:$0xff] %v2693_v0  ;;  %v1145_v9 = vadd.f32 %v1143_v62, %v1138_v52  ;;  %v1284_v12 = vpop.permute.xlu0 %1283  ;;  %v1177_v61 = vmul.f32 %v1176_v59, %v1174_v43  ;;  %v2733_v18 = vsel %vm737_vm8, %v2695_v28, %v1886_v58  ;;  %v1230_v30 = vstv %s2710_s3  ;;  %s2840_s3 = sld [smem:[#allocation5 + $0x60]] }
 0x1f7   : > { %1213 = vst [vmem:[#allocation4 + $0x10] sm:$0xff] %v1207_v39  ;;  %v1158_v51 = vadd.f32 %v1156_v6, %v1151_v40  ;;  %v2714_v10 = vpop.permute.xlu1 %1888  ;;  %v1289_v53 = vsel %vm737_vm8, %v1284_v12, %v1286_v38  ;;  %v1178_v36 = vmul.f32 %v1176_v59, %v2703_v44  ;;  %v1237_v35 = vstv %s2716_s18  ;;  %s2844_s18 = sld [smem:[#allocation5 + $0x37]] }
 0x1f8   : > { %v1152_v63 = vadd.f32 %v1150_v48, %v1145_v9  ;;  %v1218_v37 = vmul.f32 %v1216_v11, %v2693_v0  ;;  %v1891_v45 = vunpack.i.h.bf16 %v2714_v10  ;;  %v1244_v47 = vstv %s2719_s7  ;;  %s2848_s7 = sld [smem:[#allocation5 + $0x3e]] }
 0x1f9   : > { %v1165_v16 = vadd.f32 %v1163_v54, %v1158_v51  ;;  %v1890_v56 = vunpack.i.l.bf16 %v2714_v10  ;;  %v1251_v0 = vstv %s2726_s8  ;;  %v1258_v10 = vstv %s2739_s24  ;;  %s2851_s8 = sld [smem:[#allocation5 + $0x45]] }
 0x1fa   : > { %v1159_v33 = vadd.f32 %v1157_v49, %v1152_v63  ;;  %v1358_v25 = vpop.permute.xlu0 %1357  ;;  %s2854_s24 = sld [smem:[#allocation5 + $0x4c]] }
 0x1fb   : > { %v1172_v13 = vadd.f32 %v1170_v46, %v1165_v16  ;;  %v1366_v15 = vpop.permute.xlu1 %1365 }
 0x1fc   : > { %v1166_v29 = vadd.f32 %v1164_v17, %v1159_v33 }
 0x1fd   : > { %v1221_v4 = vld [vmem:[#allocation4 + $0x1] sm:$0xff]  ;;  %v1179_v2 = vadd.f32 %v1177_v61, %v1172_v13 }
 0x1fe   : > { %v1222_v42 = vld [vmem:[#allocation4 + $0x9] sm:$0xff]  ;;  %v1173_v28 = vadd.f32 %v1171_v5, %v1166_v29  ;;  %v1224_v32 = vmul.f32 %v1223_v14, %v1221_v4  ;;  %v1362_v39 = vpop.permute.xlu0 %1361 }
 0x1ff   : > { %v1228_v20 = vld [vmem:[#allocation4 + $0x2] sm:$0xff]  ;;  %v1229_v3 = vld [vmem:[#allocation4 + $0xa] sm:$0xff]  ;;  %v1219_v21 = vadd.f32 %v1217_v7, %v1179_v2  ;;  %v1225_v50 = vmul.f32 %v1223_v14, %v1222_v42  ;;  %v2756_v52 = vpop.permute.xlu1 %1439  ;;  %v2762_v51 = vsel %vm820_vm9, %v1362_v39, %v1891_v45  ;;  %v2775_v42 = vsel %vm820_vm9, %v1358_v25, %v1890_v56 }
 0x200   : > { %v1235_v22 = vld [vmem:[#allocation4 + $0x3] sm:$0xff]  ;;  %v1236_v1 = vld [vmem:[#allocation4 + $0xb] sm:$0xff]  ;;  %v1180_v41 = vadd.f32 %v1178_v36, %v1173_v28  ;;  %v1231_v60 = vmul.f32 %v1230_v30, %v1228_v20  ;;  %v1232_v6 = vmul.f32 %v1230_v30, %v1229_v3 }
 0x201   : > { %v1242_v24 = vld [vmem:[#allocation4 + $0x4] sm:$0xff]  ;;  %v2729_v23 = vld [vmem:[#allocation4 + $0xc] sm:$0xff]  ;;  %v1226_v43 = vadd.f32 %v1224_v32, %v1219_v21  ;;  %v1238_v55 = vmul.f32 %v1237_v35, %v1235_v22  ;;  %v1239_v63 = vmul.f32 %v1237_v35, %v1236_v1 }
 0x202   : > { %v1249_v26 = vld [vmem:[#allocation4 + $0x5] sm:$0xff]  ;;  %v2735_v34 = vld [vmem:[#allocation4 + $0xd] sm:$0xff]  ;;  %v1220_v44 = vadd.f32 %v1218_v37, %v1180_v41  ;;  %v1368_v62 = vpop.permute.xlu0 %1367  ;;  %v1245_v8 = vmul.f32 %v1244_v47, %v1242_v24  ;;  %v1246_v1 = vmul.f32 %v1244_v47, %v2729_v23 }
 0x203   : > { %v1256_v31 = vld [vmem:[#allocation4 + $0x6] sm:$0xff]  ;;  %v2737_v27 = vld [vmem:[#allocation4 + $0xe] sm:$0xff]  ;;  %v1233_v38 = vadd.f32 %v1231_v60, %v1226_v43  ;;  %v1371_v54 = vsel %vm820_vm9, %v1366_v15, %v1368_v62  ;;  %v1252_v46 = vmul.f32 %v1251_v0, %v1249_v26  ;;  %v1444_v24 = vpop.permute.xlu1 %1443  ;;  %v1305_v26 = vstv %s2750_s27  ;;  %s2861_s27 = sld [smem:[#allocation5 + $0x5a]] }
 0x204   : > { %1293 = vst [vmem:[#allocation4] sm:$0xff] %v2723_v19  ;;  %1294 = vst [vmem:[#allocation4 + $0x8] sm:$0xff] %v2733_v18  ;;  %v1227_v40 = vadd.f32 %v1225_v50, %v1220_v44  ;;  %v1259_v14 = vmul.f32 %v1258_v10, %v1256_v31  ;;  %v1253_v29 = vmul.f32 %v1251_v0, %v2735_v34  ;;  %v1312_v31 = vstv %s2753_s28  ;;  %s2866_s28 = sld [smem:[#allocation5 + $0x61]] }
 0x205   : > { %1295 = vst [vmem:[#allocation4 + $0x10] sm:$0xff] %v1289_v53  ;;  %v1240_v48 = vadd.f32 %v1238_v55, %v1233_v38  ;;  %v1298_v53 = vstv %s2745_s16  ;;  %v1260_v23 = vmul.f32 %v1258_v10, %v2737_v27  ;;  %v1319_v15 = vstv %s2758_s29  ;;  %s2857_s16 = sld [smem:[#allocation5 + $0x53]]  ;;  %s1644_s29 = sshll.u32 %s2163_s0, 4 }
 0x206   : > { %v1234_v12 = vadd.f32 %v1232_v6, %v1227_v40  ;;  %v1894_v3 = vpop.permute.xlu0 %1893  ;;  %v1299_v2 = vmul.f32 %v1298_v53, %v2723_v19  ;;  %v1300_v34 = vmul.f32 %v1298_v53, %v2733_v18  ;;  %v1326_v60 = vstv %s2777_s4  ;;  %s1750_s4 = sshll.u32 %s2021_s12, 8  ;;  %s2044_s12 = smov [#allocation10]  }
 0x207   : > { %v1247_v16 = vadd.f32 %v1245_v8, %v1240_v48  ;;  %v1895_v30 = vunpack.i.l.bf16 %v1894_v3  ;;  %v1450_v32 = vpop.permute.xlu1 %1449  ;;  %v1896_v39 = vunpack.i.h.bf16 %v1894_v3  ;;  %v1333_v6 = vstv %s2789_s26  ;;  %s190_s26 = scalar_lea.vmem [#allocation10], %s1644_s29 }
 0x208   : > { %v1241_v22 = vadd.f32 %v1239_v63, %v1234_v12  ;;  %v1380_v53 = vstv %s2799_s17 }
 0x209   : > { %v1254_v7 = vadd.f32 %v1252_v46, %v1247_v16  ;;  %v2807_v47 = vsel %vm903_vm10, %v2756_v52, %v1895_v30  ;;  %v2816_v52 = vsel %vm903_vm10, %v1444_v24, %v1896_v39 }
 0x20a   : > { %v1248_v25 = vadd.f32 %v1246_v1, %v1241_v22  ;;  %v1448_v35 = vpop.permute.xlu0 %1447 }
 0x20b   : > { %v1303_v59 = vld [vmem:[#allocation4 + $0x1] sm:$0xff]  ;;  %v1261_v5 = vadd.f32 %v1259_v14, %v1254_v7  ;;  %v1453_v44 = vsel %vm903_vm10, %v1448_v35, %v1450_v32  ;;  %v1387_v14 = vstv %s2802_s23 }
 0x20c   : > { %v1304_v57 = vld [vmem:[#allocation4 + $0x9] sm:$0xff]  ;;  %v1255_v28 = vadd.f32 %v1253_v29, %v1248_v25  ;;  %v1306_v21 = vmul.f32 %v1305_v26, %v1303_v59  ;;  %v1394_v25 = vstv %s2810_s5  ;;  %s2880_s5 = scalar_lea.hbm %s2932_s2, %s1750_s4 }
 0x20d   : > { %v1310_v9 = vld [vmem:[#allocation4 + $0x2] sm:$0xff]  ;;  %v1311_v49 = vld [vmem:[#allocation4 + $0xa] sm:$0xff]  ;;  %v1301_v36 = vadd.f32 %v1299_v2, %v1261_v5  ;;  %v1307_v27 = vmul.f32 %v1305_v26, %v1304_v57 }
 0x20e   : > { %v1317_v11 = vld [vmem:[#allocation4 + $0x3] sm:$0xff]  ;;  %v2766_v58 = vld [vmem:[#allocation4 + $0xb] sm:$0xff]  ;;  %v1262_v41 = vadd.f32 %v1260_v23, %v1255_v28  ;;  %v1313_v37 = vmul.f32 %v1312_v31, %v1310_v9  ;;  %v1314_v40 = vmul.f32 %v1312_v31, %v1311_v49  ;;  %v1340_v49 = vstv %s2794_s19  ;;  %s1537_s19 = sshll.u32 %s190_s26, 4  ;;  %s2882_s19 = int_to_ptr.vmem [resolvable:$true] %s1537_s19 }
 0x20f   : > { %v2768_v17 = vld [vmem:[#allocation4 + $0x4] sm:$0xff]  ;;  %v2770_v61 = vld [vmem:[#allocation4 + $0xc] sm:$0xff]  ;;  %v1308_v19 = vadd.f32 %v1306_v21, %v1301_v36  ;;  %v1320_v43 = vmul.f32 %v1319_v15, %v1317_v11  ;;  %v1321_v16 = vmul.f32 %v1319_v15, %v2766_v58  ;;  %v1382_v31 = vmul.f32 %v1380_v53, %v2762_v51 }
 0x210   : > { %v2772_v4 = vld [vmem:[#allocation4 + $0x5] sm:$0xff]  ;;  %v2780_v33 = vld [vmem:[#allocation4 + $0xd] sm:$0xff]  ;;  %v1302_v50 = vadd.f32 %v1300_v34, %v1262_v41  ;;  %v1328_v22 = vmul.f32 %v1326_v60, %v2770_v61  ;;  %v1415_v21 = vstv %s2835_s30  ;;  %s1949_s30 = sshll.u32 %s2044_s12, 4  ;;  %s1950_s30 = int_to_ptr.vmem [resolvable:$false] %s1949_s30 }
 0x211   : > { %v2782_v13 = vld [vmem:[#allocation4 + $0x6] sm:$0xff]  ;;  %v2784_v20 = vld [vmem:[#allocation4 + $0xe] sm:$0xff]  ;;  %v1315_v38 = vadd.f32 %v1313_v37, %v1308_v19  ;;  %v1335_v58 = vmul.f32 %v1333_v6, %v2780_v33  ;;  %p1952_p12 = scmp.lt.s32.totalorder %s2882_s19, %s1950_s30 }
 0x212   : > { %1375 = vst [vmem:[#allocation4] sm:$0xff] %v2775_v42  ;;  %1376 = vst [vmem:[#allocation4 + $0x8] sm:$0xff] %v2762_v51  ;;  %v1309_v57 = vadd.f32 %v1307_v27, %v1302_v50  ;;  %v1341_v7 = vmul.f32 %v1340_v49, %v2782_v13  ;;  %v1342_v61 = vmul.f32 %v1340_v49, %v2784_v20  ;;  %v1401_v13 = vstv %s2823_s6  ;;  %s1524_s6 = scalar_lea.sflag [#allocation7], %s2163_s0 }
 0x213   : > { %1377 = vst [vmem:[#allocation4 + $0x10] sm:$0xff] %v1371_v54  ;;  %v1322_v9 = vadd.f32 %v1320_v43, %v1315_v38  ;;  %v1327_v54 = vmul.f32 %v1326_v60, %v2768_v17  ;;  %v1334_v17 = vmul.f32 %v1333_v6, %v2772_v4  ;;  %v1381_v4 = vmul.f32 %v1380_v53, %v2775_v42 }
 0x214   : > { %v1316_v63 = vadd.f32 %v1314_v40, %v1309_v57  ;;  %v1408_v42 = vstv %s2830_s22  ;;  %v1422_v51 = vstv %s2840_s3  ;;  %v1462_v43 = vstv %s2844_s18  ;;  %s1945_s22 = scalar_lea.vmem %s2882_s19, 256  ;;  %s1951_s3 = scalar_lea.vmem %s1950_s30, 512 }
 0x215   : > { %v1329_v46 = vadd.f32 %v1327_v54, %v1322_v9  ;;  %v1476_v6 = vstv %s2851_s8  ;;  %p1946_p3 = scmp.ne.s32.totalorder %s2882_s19, %s1945_s22  ;;  %p1953_p13 = scmp.lt.s32.totalorder %s1951_s3, %s1945_s22 }
 0x216   : > { %v1323_v3 = vadd.f32 %v1321_v16, %v1316_v63 }
 0x217   : > { %v1336_v1 = vadd.f32 %v1334_v17, %v1329_v46  ;;  %v1490_v17 = vstv %s2857_s16  ;;  %p1947_p7 = pnand %p1946_p3, %p2110_p8  ;;  %p1954_p2 = por %p1953_p13, %p1952_p12 }
 0x218   : > { %v1330_v24 = vadd.f32 %v1328_v22, %v1323_v3 }
 0x219   : > { %v1385_v18 = vld [vmem:[#allocation4 + $0x1] sm:$0xff]  ;;  %v1343_v26 = vadd.f32 %v1341_v7, %v1336_v1  ;;  %p1948_p9 = pneg %p1947_p7 }
 0x21a   : > { %v1386_v45 = vld [vmem:[#allocation4 + $0x9] sm:$0xff]  ;;  %v1337_v29 = vadd.f32 %v1335_v58, %v1330_v24  ;;  %v1388_v2 = vmul.f32 %v1387_v14, %v1385_v18  ;;  %v1469_v18 = vstv %s2848_s7 }
 0x21b   : > { %v1392_v55 = vld [vmem:[#allocation4 + $0x2] sm:$0xff]  ;;  %v1393_v56 = vld [vmem:[#allocation4 + $0xa] sm:$0xff]  ;;  %v1383_v5 = vadd.f32 %v1381_v4, %v1343_v26  ;;  %v1389_v28 = vmul.f32 %v1387_v14, %v1386_v45  ;;  %v1497_v14 = vstv %s2861_s27  ;;  %p1955_p5 = pnand %p1954_p2, %p1948_p9 }
 0x21c   : > { %v1399_v0 = vld [vmem:[#allocation4 + $0x3] sm:$0xff]  ;;  %v1400_v62 = vld [vmem:[#allocation4 + $0xb] sm:$0xff]  ;;  %v1344_v23 = vadd.f32 %v1342_v61, %v1337_v29  ;;  %v1395_v15 = vmul.f32 %v1394_v25, %v1392_v55  ;;  %v1396_v35 = vmul.f32 %v1394_v25, %v1393_v56 }
 0x21d   : > { %v1406_v48 = vld [vmem:[#allocation4 + $0x4] sm:$0xff]  ;;  %v2813_v8 = vld [vmem:[#allocation4 + $0xc] sm:$0xff]  ;;  %v1390_v33 = vadd.f32 %v1388_v2, %v1383_v5  ;;  %v1402_v20 = vmul.f32 %v1401_v13, %v1399_v0  ;;  %v1403_v19 = vmul.f32 %v1401_v13, %v1400_v62  ;;  %v1463_v62 = vmul.f32 %v1462_v43, %v2807_v47 }
 0x21e   : > { %v1413_v59 = vld [vmem:[#allocation4 + $0x5] sm:$0xff]  ;;  %v2819_v10 = vld [vmem:[#allocation4 + $0xd] sm:$0xff]  ;;  %v1384_v30 = vadd.f32 %v1382_v31, %v1344_v23  ;;  %v1409_v39 = vmul.f32 %v1408_v42, %v1406_v48  ;;  %v1410_v45 = vmul.f32 %v1408_v42, %v2813_v8 }
 0x21f   : > { %v1420_v11 = vld [vmem:[#allocation4 + $0x6] sm:$0xff]  ;;  %v2821_v12 = vld [vmem:[#allocation4 + $0xe] sm:$0xff]  ;;  %v1397_v36 = vadd.f32 %v1395_v15, %v1390_v33  ;;  %v1416_v27 = vmul.f32 %v1415_v21, %v1413_v59  ;;  %v1417_v56 = vmul.f32 %v1415_v21, %v2819_v10  ;;  %v1464_v10 = vmul.f32 %v1462_v43, %v2816_v52 }
 0x220   : > { %1457 = vst [vmem:[#allocation4] sm:$0xff] %v2807_v47  ;;  %1458 = vst [vmem:[#allocation4 + $0x8] sm:$0xff] %v2816_v52  ;;  %v1391_v32 = vadd.f32 %v1389_v28, %v1384_v30  ;;  %v1423_v50 = vmul.f32 %v1422_v51, %v1420_v11  ;;  %v1424_v8 = vmul.f32 %v1422_v51, %v2821_v12  ;;  %v1483_v11 = vstv %s2854_s24 }
 0x221   : > { %1459 = vst [vmem:[#allocation4 + $0x10] sm:$0xff] %v1453_v44  ;;  %v1404_v34 = vadd.f32 %v1402_v20, %v1397_v36  ;;  %v1504_v52 = vstv %s2866_s28 }
 0x222   : > { %v1398_v41 = vadd.f32 %v1396_v35, %v1391_v32 }
 0x223   : > { %v1411_v37 = vadd.f32 %v1409_v39, %v1404_v34 }
 0x224   : > { %v1405_v60 = vadd.f32 %v1403_v19, %v1398_v41 }
 0x225   : > { %v1418_v44 = vadd.f32 %v1416_v27, %v1411_v37 }
 0x226   : > { %v1412_v55 = vadd.f32 %v1410_v45, %v1405_v60 }
 0x227   : > { %v1467_v38 = vld [vmem:[#allocation4 + $0x1] sm:$0xff]  ;;  %v1425_v0 = vadd.f32 %v1423_v50, %v1418_v44 }
 0x228   : > { %v1474_v40 = vld [vmem:[#allocation4 + $0x2] sm:$0xff]  ;;  %v1419_v48 = vadd.f32 %v1417_v56, %v1412_v55  ;;  %v1470_v57 = vmul.f32 %v1469_v18, %v1467_v38  ;;  %v1475_v47 = vld [vmem:[#allocation4 + $0xa] sm:$0xff] }
 0x229   : > { %v1465_v59 = vadd.f32 %v1463_v62, %v1425_v0  ;;  %v1468_v9 = vld [vmem:[#allocation4 + $0x9] sm:$0xff]  ;;  %v1477_v16 = vmul.f32 %v1476_v6, %v1474_v40  ;;  %v1478_v58 = vmul.f32 %v1476_v6, %v1475_v47 }
 0x22a   : > { %v1481_v54 = vld [vmem:[#allocation4 + $0x3] sm:$0xff]  ;;  %v1426_v49 = vadd.f32 %v1424_v8, %v1419_v48  ;;  %v1471_v3 = vmul.f32 %v1469_v18, %v1468_v9  ;;  %v1482_v12 = vld [vmem:[#allocation4 + $0xb] sm:$0xff] }
 0x22b   : > { %v1472_v63 = vadd.f32 %v1470_v57, %v1465_v59  ;;  %v1488_v46 = vld [vmem:[#allocation4 + $0x4] sm:$0xff]  ;;  %v1484_v1 = vmul.f32 %v1483_v11, %v1481_v54  ;;  %v1489_v25 = vld [vmem:[#allocation4 + $0xc] sm:$0xff]  ;;  %v1485_v5 = vmul.f32 %v1483_v11, %v1482_v12 }
 0x22c   : > { %v1466_v53 = vadd.f32 %v1464_v10, %v1426_v49  ;;  %v1495_v7 = vld [vmem:[#allocation4 + $0x5] sm:$0xff]  ;;  %v1491_v4 = vmul.f32 %v1490_v17, %v1488_v46  ;;  %v1496_v23 = vld [vmem:[#allocation4 + $0xd] sm:$0xff]  ;;  %v1492_v33 = vmul.f32 %v1490_v17, %v1489_v25 }
 0x22d   : > { %v1479_v22 = vadd.f32 %v1477_v16, %v1472_v63  ;;  %v1502_v29 = vld [vmem:[#allocation4 + $0x6] sm:$0xff]  ;;  %v1498_v13 = vmul.f32 %v1497_v14, %v1495_v7  ;;  %v1503_v30 = vld [vmem:[#allocation4 + $0xe] sm:$0xff]  ;;  %v1499_v36 = vmul.f32 %v1497_v14, %v1496_v23 }
 0x22e   : > { %v1473_v24 = vadd.f32 %v1471_v3, %v1466_v53  ;;  %v1505_v42 = vmul.f32 %v1504_v52, %v1502_v29  ;;  %v1506_v32 = vmul.f32 %v1504_v52, %v1503_v30 }
 0x22f   : > { %v1486_v26 = vadd.f32 %v1484_v1, %v1479_v22 }
 0x230   : > { %v1480_v61 = vadd.f32 %v1478_v58, %v1473_v24 }
 0x231   : > { %v1493_v2 = vadd.f32 %v1491_v4, %v1486_v26 }
 0x232   : > { %v1487_v31 = vadd.f32 %v1485_v5, %v1480_v61 }
 0x233   : > { %v1500_v15 = vadd.f32 %v1498_v13, %v1493_v2 }
 0x234   : > { %v1494_v28 = vadd.f32 %v1492_v33, %v1487_v31 }
 0x235   : > { %v1507_v20 = vadd.f32 %v1505_v42, %v1500_v15 }
 0x236   : > { %v1501_v21 = vadd.f32 %v1499_v36, %v1494_v28 }
 0x237   : > { %v1742_v35 = vmul.f32 -1.442695, %v1507_v20 }
 0x238   : > { %v1508_v34 = vadd.f32 %v1506_v32, %v1501_v21 }
 0x239   : > { %1897 = vpow2.f32 %v1742_v35 }
 0x23a   : > { %v1743_v39 = vmul.f32 -1.442695, %v1508_v34 }
 0x23c   : > { %1899 = vpow2.f32 %v1743_v39 }
 0x246   : > { %v1898_v51 = vpop.eup %1897 }
 0x247   : > { %v1515_v41 = vadd.f32 1.0, %v1898_v51 }
 0x249   : > { %1901 = vrcp.f32 %v1515_v41  ;;  %v1900_v19 = vpop.eup %1899 }
 0x24a   : > { %v1516_v37 = vadd.f32 1.0, %v1900_v19 }
 0x24c   : > { %1903 = vrcp.f32 %v1516_v37 }
 0x256   : > { %v1902_v27 = vpop.eup %1901 }
 0x257   : > { %1521 = vst [vmem:[%s190_s26] sm:$0xff] %v1902_v27 }
 0x259   : > { %v1904_v43 = vpop.eup %1903 }
 0x25a   : > { %1522 = vst [vmem:[%s190_s26 + $0x8] sm:$0xff] %v1904_v43 }
 0x25b   : > { %1958 = shalt.err (!%p1955_p5)
}
 0x25c   : > { %s1959_s18 = scalar_lea.hbm %s2880_s5, 256  ;;  %s1963_s24 = scalar_lea.hbm %s2932_s2, 512 }
 0x25d   : > { %p1960_p10 = scmp.ne.s32.totalorder %s2880_s5, %s1959_s18  ;;  %p1964_p0 = scmp.lt.s32.totalorder %s2880_s5, %s2932_s2 }
 0x25e   : > { %p1965_p4 = scmp.lt.s32.totalorder %s1963_s24, %s1959_s18 }
 0x25f   : > { %p1961_p11 = pnand %p1960_p10, %p2110_p8 }
 0x260   : > { %p1966_p6 = por %p1965_p4, %p1964_p0 }
 0x261   : > { %p1962_p1 = pneg %p1961_p11 }
 0x263   : > { %p1967_p3 = pnand %p1966_p6, %p1962_p1 }
 0x265   : > { %1970 = shalt.err (!%p1967_p3)
}
 0x266   : > { %s2045_s28 = smov 128   ;;  %s2046_s29 = smov 8  }
 0x267   : > { %1757 = dma.vmem_to_hbm [thread:$0]  (%p2110_p8), %s2882_s19, 256, %s2880_s5, %s1524_s6, %s2045_s28, %s2045_s28, %s2046_s29  }
 0x268 PF: > { %s1552_s4 = sand.u32 1, %s2009_s9   ;;  %p2941_p7 = scmp.ne.s32.totalorder %s2937_s21, 0 }
 0x269   : > { %p2942_p9 = scmp.ge.s32.totalorder %s2029_s14, 2  ;;  %s1553_s26 = scalar_lea.sflag [#allocation7], %s1552_s4 }
 0x26b   : > { %p1768_p12 = pnand %p2942_p9, %p2941_p7 }
 0x26d   : > { %p1769_p13 = pneg %p1768_p12 }
 0x26f   : > { %2004 = dma.done.wait (%p1769_p13), %s1553_s26, 256  }
 0x270   : > { %2006 = vsyncadd (%p1769_p13), %s1553_s26, 4294967040  ;;  %s19_s14 = sadd.s32 1, %s2029_s14   ;;  %s2943_s9 = smov %s2013_s10 }
 0x271   : > { %p16_p2 = scmp.ge.s32.totalorder %s19_s14, 4   ;;  %s2944_s10 = smov %s2017_s11 }
 0x272   : > { %s2945_s11 = smov %s2150_s15  ;;  %s2946_s12 = smov %s2025_s13 }
 0x273   : > { %s2947_s13 = smov %s2949_s25  ;;  %18 = sbr.rel (!%p16_p2) target bundleno = 9 (0x9), region = 89 }
 0x278   :  { %1558 = vsyncpa [#allocation6], 1 }
 0x279   :  { %1560 = vsyncpa [#allocation6 + $0x1], 1 }
 0x27a   :  { %1561 = vsyncpa [#allocation7], 1 }
 0x27b   :  { %1563 = vsyncpa [#allocation7 + $0x1], 1 }
 0x27c   :  { %1564 = vsyncpa [#allocation8], 1 }
 0x27d   :  { %1566 = vsyncpa [#allocation8 + $0x1], 1 }

</bundles_post_ra>
